<compile_context>
chip_gen: v7x
topology: tpu7x:2x2x1
jax: 0.10.0
libtpu: 0.0.40
codegen_flags: <defaults>
</compile_context>

<pallas_src>
import functools
import math

import jax
import jax.numpy as jnp
from jax.experimental import pallas as pl
from jax.experimental.pallas import tpu as pltpu

LANE = 128   # TPU vreg lane width
SUB = 8      # TPU vreg sublane count (f32)


def _round_up(n, m):
    return ((n + m - 1) // m) * m


def _pad2d(a, rows, cols):
    r, c = a.shape
    return jnp.pad(a, ((0, rows - r), (0, cols - c)))


# ----------------------------------------------------------------------------
# Fused kernel: all RNN layers (relu recurrence) + fc1/relu/fc2/relu/log_softmax.
# No grid: whole problem is resident in VMEM.
#   x_ref   : (S, BP, DP)              padded input sequence
#   wih_ref : (L, DP, DP)              W_ih^T per layer (zero padded)
#   whh_ref : (L, DP, DP)              W_hh^T per layer (zero padded)
#   b_ref   : (L, BP, DP)              (b_ih + b_hh) replicated over sublanes
#   w1/b1, w2/b2                       padded head weights
#   out_ref : (BP, DP)                 log-probs (row 0 / first n_out lanes valid)
#   seq_ref : (S, BP, DP) VMEM scratch layer-to-layer sequence activations
# ----------------------------------------------------------------------------
def fused_rnn_kernel(x_ref, wih_ref, whh_ref, b_ref,
                     w1_ref, b1_ref, w2_ref, b2_ref,
                     out_ref, seq_ref, *, n_out):
    seq_len, bp, dp = seq_ref.shape
    n_layers = wih_ref.shape[0]

    h_last = jnp.zeros((bp, dp), jnp.float32)
    for layer in range(n_layers):                      # static, small
        wih = wih_ref[layer]                           # (dp, dp)
        whh = whh_ref[layer]                           # (dp, dp)
        b = b_ref[layer]                               # (bp, dp)

        # Hoisted input projection for the whole sequence + bias (once per layer).
        xin = (x_ref[...] if layer == 0 else seq_ref[...]).reshape(seq_len * bp, dp)
        proj = jnp.dot(xin, wih, preferred_element_type=jnp.float32)
        seq_ref[...] = proj.reshape(seq_len, bp, dp) + b[None]

        # Serial recurrence: only h_prev @ W_hh^T is on the latency chain.
        def step(t, h_prev):
            h_new = jnp.maximum(
                seq_ref[t]
                + jnp.dot(h_prev, whh, preferred_element_type=jnp.float32),
                0.0)
            seq_ref[t] = h_new                         # feed next layer
            return h_new

        h_last = jax.lax.fori_loop(
            0, seq_len, step, jnp.zeros((bp, dp), jnp.float32), unroll=True)

    # Head: fc1 -> relu -> fc2 -> relu -> log_softmax over first n_out lanes.
    z1 = jnp.maximum(
        jnp.dot(h_last, w1_ref[...], preferred_element_type=jnp.float32) + b1_ref[...],
        0.0)
    z2 = jnp.maximum(
        jnp.dot(z1, w2_ref[...], preferred_element_type=jnp.float32) + b2_ref[...],
        0.0)                                           # (bp, dp); padded lanes == 0
    lane = jax.lax.broadcasted_iota(jnp.int32, z2.shape, 1)
    logits = jnp.where(lane < n_out, z2, -1e30)        # mask padded class lanes
    m = jnp.max(logits, axis=-1, keepdims=True)
    e = jnp.exp(logits - m)
    lse = jnp.log(jnp.sum(e, axis=-1, keepdims=True)) + m
    out_ref[...] = z2 - lse


# ----------------------------------------------------------------------------
# Wrappers
# ----------------------------------------------------------------------------
def build_padded_params(params, input_dim, h, n_out, batch):
    dp = _round_up(max(input_dim, h, n_out), LANE)
    bp = _round_up(batch, SUB)
    wih_l, whh_l, b_l = [], [], []
    for (w_ih_t, w_hh_t, b_row) in params["rnn_layers"]:
        wih_l.append(_pad2d(w_ih_t, dp, dp))
        whh_l.append(_pad2d(w_hh_t, dp, dp))
        b_pad = jnp.pad(b_row[0], (0, dp - b_row.shape[1]))
        b_l.append(jnp.tile(b_pad[None, :], (bp, 1)))
    return {
        "wih": jnp.stack(wih_l),
        "whh": jnp.stack(whh_l),
        "b": jnp.stack(b_l),
        "w1": _pad2d(params["w1_t"], dp, dp),
        "b1": jnp.tile(jnp.pad(params["b1"][0], (0, dp - h))[None, :], (bp, 1)),
        "w2": _pad2d(params["w2_t"], dp, dp),
        "b2": jnp.tile(jnp.pad(params["b2"][0], (0, dp - n_out))[None, :], (bp, 1)),
    }, dp, bp


@functools.partial(jax.jit, static_argnames=("n_out",))
def rnn_module_forward(x, padded, n_out=5):
    # Mirrors: out, hn = rnn(x); out = out[-1][0];
    #          predicted = log_softmax(relu(fc2(relu(fc1(out)))))
    seq_len, batch, input_dim = x.shape
    dp = padded["wih"].shape[-1]
    bp = padded["b"].shape[1]
    x_pad = jnp.pad(x, ((0, 0), (0, bp - batch), (0, dp - input_dim)))

    kernel = functools.partial(fused_rnn_kernel, n_out=n_out)
    logp = pl.pallas_call(
        kernel,
        out_shape=jax.ShapeDtypeStruct((bp, dp), jnp.float32),
        in_specs=[pl.BlockSpec(memory_space=pltpu.MemorySpace.VMEM)] * 8,
        out_specs=pl.BlockSpec(memory_space=pltpu.MemorySpace.VMEM),
        scratch_shapes=[pltpu.VMEM((seq_len, bp, dp), jnp.float32)],
    )(x_pad, padded["wih"], padded["whh"], padded["b"],
      padded["w1"], padded["b1"], padded["w2"], padded["b2"])
    return logp[0, :n_out]          # batch element 0 of last timestep -> (n_out,)


# Pure-JAX reference for verification (unpadded math).
def reference_forward(x, params):
    seq_len, batch, _ = x.shape
    inp = x
    for (w_ih_t, w_hh_t, b_row) in params["rnn_layers"]:
        hdim = w_hh_t.shape[0]
        hprev = jnp.zeros((batch, hdim), jnp.float32)
        outs = []
        for t in range(seq_len):
            hprev = jnp.maximum(inp[t] @ w_ih_t + hprev @ w_hh_t + b_row, 0.0)
            outs.append(hprev)
        inp = jnp.stack(outs, axis=0)
    o = inp[seq_len - 1, 0]
    z1 = jnp.maximum(o @ params["w1_t"] + params["b1"][0], 0.0)
    z2 = jnp.maximum(z1 @ params["w2_t"] + params["b2"][0], 0.0)
    return jax.nn.log_softmax(z2)


def init_params(key, input_dim, h, n_layers, n_out=5):
    # PyTorch nn.RNN / nn.Linear default: U(-1/sqrt(fan), 1/sqrt(fan))
    layers = []
    bound = 1.0 / math.sqrt(h)
    for layer in range(n_layers):
        in_dim = input_dim if layer == 0 else h
        key, k1, k2, k3, k4 = jax.random.split(key, 5)
        w_ih = jax.random.uniform(k1, (h, in_dim), jnp.float32, -bound, bound)
        w_hh = jax.random.uniform(k2, (h, h), jnp.float32, -bound, bound)
        b_ih = jax.random.uniform(k3, (h,), jnp.float32, -bound, bound)
        b_hh = jax.random.uniform(k4, (h,), jnp.float32, -bound, bound)
        layers.append((w_ih.T, w_hh.T, (b_ih + b_hh).reshape(1, h)))

    key, k1, k2, k3, k4 = jax.random.split(key, 5)
    w1 = jax.random.uniform(k1, (h, h), jnp.float32, -bound, bound)
    b1 = jax.random.uniform(k2, (h,), jnp.float32, -bound, bound)
    w2 = jax.random.uniform(k3, (n_out, h), jnp.float32, -bound, bound)
    b2 = jax.random.uniform(k4, (n_out,), jnp.float32, -bound, bound)
    return {
        "rnn_layers": layers,
        "w1_t": w1.T, "b1": b1.reshape(1, h),
        "w2_t": w2.T, "b2": b2.reshape(1, n_out),
    }


if __name__ == "__main__":
    seq_len, batch, input_dim, h, n_layers, n_out = 8, 2, 16, 32, 2, 5

    key = jax.random.PRNGKey(0)
    key, kx, kp = jax.random.split(key, 3)
    x = jax.random.normal(kx, (seq_len, batch, input_dim), jnp.float32)
    params = init_params(kp, input_dim, h, n_layers, n_out)
    padded, dp, bp = build_padded_params(params, input_dim, h, n_out, batch)

    out = rnn_module_forward(x, padded, n_out=n_out)
    out = jax.block_until_ready(out)

    ref = reference_forward(x, params)
    assert out.shape == (n_out,)
    assert jnp.allclose(out, ref, atol=1e-4, rtol=1e-4), (out, ref)

    print("KERNEL_OK")
</pallas_src>

<mosaic_0001>
module attributes {stable_mosaic.version = 11 : i64} {
  func.func @fused_rnn_kernel(%arg0: memref<8x8x128xf32, #tpu.memory_space<vmem>>, %arg1: memref<2x128x128xf32, #tpu.memory_space<vmem>>, %arg2: memref<2x128x128xf32, #tpu.memory_space<vmem>>, %arg3: memref<2x8x128xf32, #tpu.memory_space<vmem>>, %arg4: memref<128x128xf32, #tpu.memory_space<vmem>>, %arg5: memref<8x128xf32, #tpu.memory_space<vmem>>, %arg6: memref<128x128xf32, #tpu.memory_space<vmem>>, %arg7: memref<8x128xf32, #tpu.memory_space<vmem>>, %arg8: memref<8x128xf32, #tpu.memory_space<vmem>>, %arg9: memref<8x8x128xf32, #tpu.memory_space<vmem>>) attributes {dimension_semantics = [], scalar_prefetch = 0 : i64, scratch_operands = 1 : i64, tpu.core_type = #tpu.core_type<tc>} {
    %c0 = arith.constant 0 : index
    %c0_0 = arith.constant 0 : index
    %c0_1 = arith.constant 0 : index
    %0 = vector.load %arg1[%c0, %c0_0, %c0_1] : memref<2x128x128xf32, #tpu.memory_space<vmem>>, vector<1x128x128xf32>
    %1 = vector.shape_cast %0 : vector<1x128x128xf32> to vector<128x128xf32>
    %c0_2 = arith.constant 0 : index
    %c0_3 = arith.constant 0 : index
    %c0_4 = arith.constant 0 : index
    %2 = vector.load %arg2[%c0_2, %c0_3, %c0_4] : memref<2x128x128xf32, #tpu.memory_space<vmem>>, vector<1x128x128xf32>
    %3 = vector.shape_cast %2 : vector<1x128x128xf32> to vector<128x128xf32>
    %c0_5 = arith.constant 0 : index
    %c0_6 = arith.constant 0 : index
    %c0_7 = arith.constant 0 : index
    %4 = vector.load %arg3[%c0_5, %c0_6, %c0_7] : memref<2x8x128xf32, #tpu.memory_space<vmem>>, vector<1x8x128xf32>
    %5 = vector.shape_cast %4 : vector<1x8x128xf32> to vector<8x128xf32>
    %c0_8 = arith.constant 0 : index
    %c0_9 = arith.constant 0 : index
    %c0_10 = arith.constant 0 : index
    %6 = vector.load %arg0[%c0_8, %c0_9, %c0_10] : memref<8x8x128xf32, #tpu.memory_space<vmem>>, vector<8x8x128xf32>
    %7 = vector.shape_cast %6 : vector<8x8x128xf32> to vector<64x128xf32>
    %cst = arith.constant dense<0.000000e+00> : vector<64x128xf32>
    %8 = tpu.matmul %7, %1, %cst {dimension_numbers = #tpu.dot_dimension_numbers<[1], [0], [0], [1], [0, 0, 1, 1], [], []>} : vector<64x128xf32>, vector<128x128xf32>, vector<64x128xf32> -> vector<64x128xf32>
    %9 = vector.shape_cast %8 : vector<64x128xf32> to vector<8x8x128xf32>
    %10 = vector.shape_cast %5 : vector<8x128xf32> to vector<1x8x128xf32>
    %11 = vector.broadcast %10 : vector<1x8x128xf32> to vector<8x8x128xf32>
    %12 = arith.addf %9, %11 : vector<8x8x128xf32>
    %c0_11 = arith.constant 0 : index
    %c0_12 = arith.constant 0 : index
    %c0_13 = arith.constant 0 : index
    %13 = vector.load %arg9[%c0_11, %c0_12, %c0_13] : memref<8x8x128xf32, #tpu.memory_space<vmem>>, vector<8x8x128xf32>
    tpu.vector_store %arg9[%c0_11, %c0_12, %c0_13], %12 {strides = array<i32>} : memref<8x8x128xf32, #tpu.memory_space<vmem>>, vector<8x8x128xf32>,
    %cst_14 = arith.constant 0.000000e+00 : f32
    %14 = vector.broadcast %cst_14 : f32 to vector<8x128xf32>
    %c0_i32 = arith.constant 0 : i32
    %15 = arith.index_cast %c0_i32 : i32 to index
    %c0_15 = arith.constant 0 : index
    %c0_16 = arith.constant 0 : index
    %16 = vector.load %arg9[%15, %c0_15, %c0_16] : memref<8x8x128xf32, #tpu.memory_space<vmem>>, vector<1x8x128xf32>
    %17 = vector.shape_cast %16 : vector<1x8x128xf32> to vector<8x128xf32>
    %cst_17 = arith.constant dense<0.000000e+00> : vector<8x128xf32>
    %18 = tpu.matmul %14, %3, %cst_17 {dimension_numbers = #tpu.dot_dimension_numbers<[1], [0], [0], [1], [0, 0, 1, 1], [], []>} : vector<8x128xf32>, vector<128x128xf32>, vector<8x128xf32> -> vector<8x128xf32>
    %19 = arith.addf %17, %18 : vector<8x128xf32>
    %cst_18 = arith.constant 0.000000e+00 : f32
    %20 = vector.broadcast %cst_18 : f32 to vector<8x128xf32>
    %21 = arith.maximumf %19, %20 : vector<8x128xf32>
    %22 = arith.index_cast %c0_i32 : i32 to index
    %c0_19 = arith.constant 0 : index
    %c0_20 = arith.constant 0 : index
    %23 = vector.load %arg9[%22, %c0_19, %c0_20] : memref<8x8x128xf32, #tpu.memory_space<vmem>>, vector<1x8x128xf32>
    %24 = vector.shape_cast %23 : vector<1x8x128xf32> to vector<8x128xf32>
    %25 = vector.shape_cast %21 : vector<8x128xf32> to vector<1x8x128xf32>
    tpu.vector_store %arg9[%22, %c0_19, %c0_20], %25 {strides = array<i32>} : memref<8x8x128xf32, #tpu.memory_space<vmem>>, vector<1x8x128xf32>,
    %c1_i32 = arith.constant 1 : i32
    %26 = arith.index_cast %c1_i32 : i32 to index
    %c0_21 = arith.constant 0 : index
    %c0_22 = arith.constant 0 : index
    %27 = vector.load %arg9[%26, %c0_21, %c0_22] : memref<8x8x128xf32, #tpu.memory_space<vmem>>, vector<1x8x128xf32>
    %28 = vector.shape_cast %27 : vector<1x8x128xf32> to vector<8x128xf32>
    %cst_23 = arith.constant dense<0.000000e+00> : vector<8x128xf32>
    %29 = tpu.matmul %21, %3, %cst_23 {dimension_numbers = #tpu.dot_dimension_numbers<[1], [0], [0], [1], [0, 0, 1, 1], [], []>} : vector<8x128xf32>, vector<128x128xf32>, vector<8x128xf32> -> vector<8x128xf32>
    %30 = arith.addf %28, %29 : vector<8x128xf32>
    %cst_24 = arith.constant 0.000000e+00 : f32
    %31 = vector.broadcast %cst_24 : f32 to vector<8x128xf32>
    %32 = arith.maximumf %30, %31 : vector<8x128xf32>
    %33 = arith.index_cast %c1_i32 : i32 to index
    %c0_25 = arith.constant 0 : index
    %c0_26 = arith.constant 0 : index
    %34 = vector.load %arg9[%33, %c0_25, %c0_26] : memref<8x8x128xf32, #tpu.memory_space<vmem>>, vector<1x8x128xf32>
    %35 = vector.shape_cast %34 : vector<1x8x128xf32> to vector<8x128xf32>
    %36 = vector.shape_cast %32 : vector<8x128xf32> to vector<1x8x128xf32>
    tpu.vector_store %arg9[%33, %c0_25, %c0_26], %36 {strides = array<i32>} : memref<8x8x128xf32, #tpu.memory_space<vmem>>, vector<1x8x128xf32>,
    %c2_i32 = arith.constant 2 : i32
    %37 = arith.index_cast %c2_i32 : i32 to index
    %c0_27 = arith.constant 0 : index
    %c0_28 = arith.constant 0 : index
    %38 = vector.load %arg9[%37, %c0_27, %c0_28] : memref<8x8x128xf32, #tpu.memory_space<vmem>>, vector<1x8x128xf32>
    %39 = vector.shape_cast %38 : vector<1x8x128xf32> to vector<8x128xf32>
    %cst_29 = arith.constant dense<0.000000e+00> : vector<8x128xf32>
    %40 = tpu.matmul %32, %3, %cst_29 {dimension_numbers = #tpu.dot_dimension_numbers<[1], [0], [0], [1], [0, 0, 1, 1], [], []>} : vector<8x128xf32>, vector<128x128xf32>, vector<8x128xf32> -> vector<8x128xf32>
    %41 = arith.addf %39, %40 : vector<8x128xf32>
    %cst_30 = arith.constant 0.000000e+00 : f32
    %42 = vector.broadcast %cst_30 : f32 to vector<8x128xf32>
    %43 = arith.maximumf %41, %42 : vector<8x128xf32>
    %44 = arith.index_cast %c2_i32 : i32 to index
    %c0_31 = arith.constant 0 : index
    %c0_32 = arith.constant 0 : index
    %45 = vector.load %arg9[%44, %c0_31, %c0_32] : memref<8x8x128xf32, #tpu.memory_space<vmem>>, vector<1x8x128xf32>
    %46 = vector.shape_cast %45 : vector<1x8x128xf32> to vector<8x128xf32>
    %47 = vector.shape_cast %43 : vector<8x128xf32> to vector<1x8x128xf32>
    tpu.vector_store %arg9[%44, %c0_31, %c0_32], %47 {strides = array<i32>} : memref<8x8x128xf32, #tpu.memory_space<vmem>>, vector<1x8x128xf32>,
    %c3_i32 = arith.constant 3 : i32
    %48 = arith.index_cast %c3_i32 : i32 to index
    %c0_33 = arith.constant 0 : index
    %c0_34 = arith.constant 0 : index
    %49 = vector.load %arg9[%48, %c0_33, %c0_34] : memref<8x8x128xf32, #tpu.memory_space<vmem>>, vector<1x8x128xf32>
    %50 = vector.shape_cast %49 : vector<1x8x128xf32> to vector<8x128xf32>
    %cst_35 = arith.constant dense<0.000000e+00> : vector<8x128xf32>
    %51 = tpu.matmul %43, %3, %cst_35 {dimension_numbers = #tpu.dot_dimension_numbers<[1], [0], [0], [1], [0, 0, 1, 1], [], []>} : vector<8x128xf32>, vector<128x128xf32>, vector<8x128xf32> -> vector<8x128xf32>
    %52 = arith.addf %50, %51 : vector<8x128xf32>
    %cst_36 = arith.constant 0.000000e+00 : f32
    %53 = vector.broadcast %cst_36 : f32 to vector<8x128xf32>
    %54 = arith.maximumf %52, %53 : vector<8x128xf32>
    %55 = arith.index_cast %c3_i32 : i32 to index
    %c0_37 = arith.constant 0 : index
    %c0_38 = arith.constant 0 : index
    %56 = vector.load %arg9[%55, %c0_37, %c0_38] : memref<8x8x128xf32, #tpu.memory_space<vmem>>, vector<1x8x128xf32>
    %57 = vector.shape_cast %56 : vector<1x8x128xf32> to vector<8x128xf32>
    %58 = vector.shape_cast %54 : vector<8x128xf32> to vector<1x8x128xf32>
    tpu.vector_store %arg9[%55, %c0_37, %c0_38], %58 {strides = array<i32>} : memref<8x8x128xf32, #tpu.memory_space<vmem>>, vector<1x8x128xf32>,
    %c4_i32 = arith.constant 4 : i32
    %59 = arith.index_cast %c4_i32 : i32 to index
    %c0_39 = arith.constant 0 : index
    %c0_40 = arith.constant 0 : index
    %60 = vector.load %arg9[%59, %c0_39, %c0_40] : memref<8x8x128xf32, #tpu.memory_space<vmem>>, vector<1x8x128xf32>
    %61 = vector.shape_cast %60 : vector<1x8x128xf32> to vector<8x128xf32>
    %cst_41 = arith.constant dense<0.000000e+00> : vector<8x128xf32>
    %62 = tpu.matmul %54, %3, %cst_41 {dimension_numbers = #tpu.dot_dimension_numbers<[1], [0], [0], [1], [0, 0, 1, 1], [], []>} : vector<8x128xf32>, vector<128x128xf32>, vector<8x128xf32> -> vector<8x128xf32>
    %63 = arith.addf %61, %62 : vector<8x128xf32>
    %cst_42 = arith.constant 0.000000e+00 : f32
    %64 = vector.broadcast %cst_42 : f32 to vector<8x128xf32>
    %65 = arith.maximumf %63, %64 : vector<8x128xf32>
    %66 = arith.index_cast %c4_i32 : i32 to index
    %c0_43 = arith.constant 0 : index
    %c0_44 = arith.constant 0 : index
    %67 = vector.load %arg9[%66, %c0_43, %c0_44] : memref<8x8x128xf32, #tpu.memory_space<vmem>>, vector<1x8x128xf32>
    %68 = vector.shape_cast %67 : vector<1x8x128xf32> to vector<8x128xf32>
    %69 = vector.shape_cast %65 : vector<8x128xf32> to vector<1x8x128xf32>
    tpu.vector_store %arg9[%66, %c0_43, %c0_44], %69 {strides = array<i32>} : memref<8x8x128xf32, #tpu.memory_space<vmem>>, vector<1x8x128xf32>,
    %c5_i32 = arith.constant 5 : i32
    %70 = arith.index_cast %c5_i32 : i32 to index
    %c0_45 = arith.constant 0 : index
    %c0_46 = arith.constant 0 : index
    %71 = vector.load %arg9[%70, %c0_45, %c0_46] : memref<8x8x128xf32, #tpu.memory_space<vmem>>, vector<1x8x128xf32>
    %72 = vector.shape_cast %71 : vector<1x8x128xf32> to vector<8x128xf32>
    %cst_47 = arith.constant dense<0.000000e+00> : vector<8x128xf32>
    %73 = tpu.matmul %65, %3, %cst_47 {dimension_numbers = #tpu.dot_dimension_numbers<[1], [0], [0], [1], [0, 0, 1, 1], [], []>} : vector<8x128xf32>, vector<128x128xf32>, vector<8x128xf32> -> vector<8x128xf32>
    %74 = arith.addf %72, %73 : vector<8x128xf32>
    %cst_48 = arith.constant 0.000000e+00 : f32
    %75 = vector.broadcast %cst_48 : f32 to vector<8x128xf32>
    %76 = arith.maximumf %74, %75 : vector<8x128xf32>
    %77 = arith.index_cast %c5_i32 : i32 to index
    %c0_49 = arith.constant 0 : index
    %c0_50 = arith.constant 0 : index
    %78 = vector.load %arg9[%77, %c0_49, %c0_50] : memref<8x8x128xf32, #tpu.memory_space<vmem>>, vector<1x8x128xf32>
    %79 = vector.shape_cast %78 : vector<1x8x128xf32> to vector<8x128xf32>
    %80 = vector.shape_cast %76 : vector<8x128xf32> to vector<1x8x128xf32>
    tpu.vector_store %arg9[%77, %c0_49, %c0_50], %80 {strides = array<i32>} : memref<8x8x128xf32, #tpu.memory_space<vmem>>, vector<1x8x128xf32>,
    %c6_i32 = arith.constant 6 : i32
    %81 = arith.index_cast %c6_i32 : i32 to index
    %c0_51 = arith.constant 0 : index
    %c0_52 = arith.constant 0 : index
    %82 = vector.load %arg9[%81, %c0_51, %c0_52] : memref<8x8x128xf32, #tpu.memory_space<vmem>>, vector<1x8x128xf32>
    %83 = vector.shape_cast %82 : vector<1x8x128xf32> to vector<8x128xf32>
    %cst_53 = arith.constant dense<0.000000e+00> : vector<8x128xf32>
    %84 = tpu.matmul %76, %3, %cst_53 {dimension_numbers = #tpu.dot_dimension_numbers<[1], [0], [0], [1], [0, 0, 1, 1], [], []>} : vector<8x128xf32>, vector<128x128xf32>, vector<8x128xf32> -> vector<8x128xf32>
    %85 = arith.addf %83, %84 : vector<8x128xf32>
    %cst_54 = arith.constant 0.000000e+00 : f32
    %86 = vector.broadcast %cst_54 : f32 to vector<8x128xf32>
    %87 = arith.maximumf %85, %86 : vector<8x128xf32>
    %88 = arith.index_cast %c6_i32 : i32 to index
    %c0_55 = arith.constant 0 : index
    %c0_56 = arith.constant 0 : index
    %89 = vector.load %arg9[%88, %c0_55, %c0_56] : memref<8x8x128xf32, #tpu.memory_space<vmem>>, vector<1x8x128xf32>
    %90 = vector.shape_cast %89 : vector<1x8x128xf32> to vector<8x128xf32>
    %91 = vector.shape_cast %87 : vector<8x128xf32> to vector<1x8x128xf32>
    tpu.vector_store %arg9[%88, %c0_55, %c0_56], %91 {strides = array<i32>} : memref<8x8x128xf32, #tpu.memory_space<vmem>>, vector<1x8x128xf32>,
    %c7_i32 = arith.constant 7 : i32
    %92 = arith.index_cast %c7_i32 : i32 to index
    %c0_57 = arith.constant 0 : index
    %c0_58 = arith.constant 0 : index
    %93 = vector.load %arg9[%92, %c0_57, %c0_58] : memref<8x8x128xf32, #tpu.memory_space<vmem>>, vector<1x8x128xf32>
    %94 = vector.shape_cast %93 : vector<1x8x128xf32> to vector<8x128xf32>
    %cst_59 = arith.constant dense<0.000000e+00> : vector<8x128xf32>
    %95 = tpu.matmul %87, %3, %cst_59 {dimension_numbers = #tpu.dot_dimension_numbers<[1], [0], [0], [1], [0, 0, 1, 1], [], []>} : vector<8x128xf32>, vector<128x128xf32>, vector<8x128xf32> -> vector<8x128xf32>
    %96 = arith.addf %94, %95 : vector<8x128xf32>
    %cst_60 = arith.constant 0.000000e+00 : f32
    %97 = vector.broadcast %cst_60 : f32 to vector<8x128xf32>
    %98 = arith.maximumf %96, %97 : vector<8x128xf32>
    %99 = arith.index_cast %c7_i32 : i32 to index
    %c0_61 = arith.constant 0 : index
    %c0_62 = arith.constant 0 : index
    %100 = vector.load %arg9[%99, %c0_61, %c0_62] : memref<8x8x128xf32, #tpu.memory_space<vmem>>, vector<1x8x128xf32>
    %101 = vector.shape_cast %100 : vector<1x8x128xf32> to vector<8x128xf32>
    %102 = vector.shape_cast %98 : vector<8x128xf32> to vector<1x8x128xf32>
    tpu.vector_store %arg9[%99, %c0_61, %c0_62], %102 {strides = array<i32>} : memref<8x8x128xf32, #tpu.memory_space<vmem>>, vector<1x8x128xf32>,
    %c8_i32 = arith.constant 8 : i32
    %c1 = arith.constant 1 : index
    %c0_63 = arith.constant 0 : index
    %c0_64 = arith.constant 0 : index
    %103 = vector.load %arg1[%c1, %c0_63, %c0_64] : memref<2x128x128xf32, #tpu.memory_space<vmem>>, vector<1x128x128xf32>
    %104 = vector.shape_cast %103 : vector<1x128x128xf32> to vector<128x128xf32>
    %c1_65 = arith.constant 1 : index
    %c0_66 = arith.constant 0 : index
    %c0_67 = arith.constant 0 : index
    %105 = vector.load %arg2[%c1_65, %c0_66, %c0_67] : memref<2x128x128xf32, #tpu.memory_space<vmem>>, vector<1x128x128xf32>
    %106 = vector.shape_cast %105 : vector<1x128x128xf32> to vector<128x128xf32>
    %c1_68 = arith.constant 1 : index
    %c0_69 = arith.constant 0 : index
    %c0_70 = arith.constant 0 : index
    %107 = vector.load %arg3[%c1_68, %c0_69, %c0_70] : memref<2x8x128xf32, #tpu.memory_space<vmem>>, vector<1x8x128xf32>
    %108 = vector.shape_cast %107 : vector<1x8x128xf32> to vector<8x128xf32>
    %c0_71 = arith.constant 0 : index
    %c0_72 = arith.constant 0 : index
    %c0_73 = arith.constant 0 : index
    %109 = vector.load %arg9[%c0_71, %c0_72, %c0_73] : memref<8x8x128xf32, #tpu.memory_space<vmem>>, vector<8x8x128xf32>
    %110 = vector.shape_cast %109 : vector<8x8x128xf32> to vector<64x128xf32>
    %cst_74 = arith.constant dense<0.000000e+00> : vector<64x128xf32>
    %111 = tpu.matmul %110, %104, %cst_74 {dimension_numbers = #tpu.dot_dimension_numbers<[1], [0], [0], [1], [0, 0, 1, 1], [], []>} : vector<64x128xf32>, vector<128x128xf32>, vector<64x128xf32> -> vector<64x128xf32>
    %112 = vector.shape_cast %111 : vector<64x128xf32> to vector<8x8x128xf32>
    %113 = vector.shape_cast %108 : vector<8x128xf32> to vector<1x8x128xf32>
    %114 = vector.broadcast %113 : vector<1x8x128xf32> to vector<8x8x128xf32>
    %115 = arith.addf %112, %114 : vector<8x8x128xf32>
    %c0_75 = arith.constant 0 : index
    %c0_76 = arith.constant 0 : index
    %c0_77 = arith.constant 0 : index
    %116 = vector.load %arg9[%c0_75, %c0_76, %c0_77] : memref<8x8x128xf32, #tpu.memory_space<vmem>>, vector<8x8x128xf32>
    tpu.vector_store %arg9[%c0_75, %c0_76, %c0_77], %115 {strides = array<i32>} : memref<8x8x128xf32, #tpu.memory_space<vmem>>, vector<8x8x128xf32>,
    %cst_78 = arith.constant 0.000000e+00 : f32
    %117 = vector.broadcast %cst_78 : f32 to vector<8x128xf32>
    %c0_i32_79 = arith.constant 0 : i32
    %118 = arith.index_cast %c0_i32_79 : i32 to index
    %c0_80 = arith.constant 0 : index
    %c0_81 = arith.constant 0 : index
    %119 = vector.load %arg9[%118, %c0_80, %c0_81] : memref<8x8x128xf32, #tpu.memory_space<vmem>>, vector<1x8x128xf32>
    %120 = vector.shape_cast %119 : vector<1x8x128xf32> to vector<8x128xf32>
    %cst_82 = arith.constant dense<0.000000e+00> : vector<8x128xf32>
    %121 = tpu.matmul %117, %106, %cst_82 {dimension_numbers = #tpu.dot_dimension_numbers<[1], [0], [0], [1], [0, 0, 1, 1], [], []>} : vector<8x128xf32>, vector<128x128xf32>, vector<8x128xf32> -> vector<8x128xf32>
    %122 = arith.addf %120, %121 : vector<8x128xf32>
    %cst_83 = arith.constant 0.000000e+00 : f32
    %123 = vector.broadcast %cst_83 : f32 to vector<8x128xf32>
    %124 = arith.maximumf %122, %123 : vector<8x128xf32>
    %125 = arith.index_cast %c0_i32_79 : i32 to index
    %c0_84 = arith.constant 0 : index
    %c0_85 = arith.constant 0 : index
    %126 = vector.load %arg9[%125, %c0_84, %c0_85] : memref<8x8x128xf32, #tpu.memory_space<vmem>>, vector<1x8x128xf32>
    %127 = vector.shape_cast %126 : vector<1x8x128xf32> to vector<8x128xf32>
    %128 = vector.shape_cast %124 : vector<8x128xf32> to vector<1x8x128xf32>
    tpu.vector_store %arg9[%125, %c0_84, %c0_85], %128 {strides = array<i32>} : memref<8x8x128xf32, #tpu.memory_space<vmem>>, vector<1x8x128xf32>,
    %c1_i32_86 = arith.constant 1 : i32
    %129 = arith.index_cast %c1_i32_86 : i32 to index
    %c0_87 = arith.constant 0 : index
    %c0_88 = arith.constant 0 : index
    %130 = vector.load %arg9[%129, %c0_87, %c0_88] : memref<8x8x128xf32, #tpu.memory_space<vmem>>, vector<1x8x128xf32>
    %131 = vector.shape_cast %130 : vector<1x8x128xf32> to vector<8x128xf32>
    %cst_89 = arith.constant dense<0.000000e+00> : vector<8x128xf32>
    %132 = tpu.matmul %124, %106, %cst_89 {dimension_numbers = #tpu.dot_dimension_numbers<[1], [0], [0], [1], [0, 0, 1, 1], [], []>} : vector<8x128xf32>, vector<128x128xf32>, vector<8x128xf32> -> vector<8x128xf32>
    %133 = arith.addf %131, %132 : vector<8x128xf32>
    %cst_90 = arith.constant 0.000000e+00 : f32
    %134 = vector.broadcast %cst_90 : f32 to vector<8x128xf32>
    %135 = arith.maximumf %133, %134 : vector<8x128xf32>
    %136 = arith.index_cast %c1_i32_86 : i32 to index
    %c0_91 = arith.constant 0 : index
    %c0_92 = arith.constant 0 : index
    %137 = vector.load %arg9[%136, %c0_91, %c0_92] : memref<8x8x128xf32, #tpu.memory_space<vmem>>, vector<1x8x128xf32>
    %138 = vector.shape_cast %137 : vector<1x8x128xf32> to vector<8x128xf32>
    %139 = vector.shape_cast %135 : vector<8x128xf32> to vector<1x8x128xf32>
    tpu.vector_store %arg9[%136, %c0_91, %c0_92], %139 {strides = array<i32>} : memref<8x8x128xf32, #tpu.memory_space<vmem>>, vector<1x8x128xf32>,
    %c2_i32_93 = arith.constant 2 : i32
    %140 = arith.index_cast %c2_i32_93 : i32 to index
    %c0_94 = arith.constant 0 : index
    %c0_95 = arith.constant 0 : index
    %141 = vector.load %arg9[%140, %c0_94, %c0_95] : memref<8x8x128xf32, #tpu.memory_space<vmem>>, vector<1x8x128xf32>
    %142 = vector.shape_cast %141 : vector<1x8x128xf32> to vector<8x128xf32>
    %cst_96 = arith.constant dense<0.000000e+00> : vector<8x128xf32>
    %143 = tpu.matmul %135, %106, %cst_96 {dimension_numbers = #tpu.dot_dimension_numbers<[1], [0], [0], [1], [0, 0, 1, 1], [], []>} : vector<8x128xf32>, vector<128x128xf32>, vector<8x128xf32> -> vector<8x128xf32>
    %144 = arith.addf %142, %143 : vector<8x128xf32>
    %cst_97 = arith.constant 0.000000e+00 : f32
    %145 = vector.broadcast %cst_97 : f32 to vector<8x128xf32>
    %146 = arith.maximumf %144, %145 : vector<8x128xf32>
    %147 = arith.index_cast %c2_i32_93 : i32 to index
    %c0_98 = arith.constant 0 : index
    %c0_99 = arith.constant 0 : index
    %148 = vector.load %arg9[%147, %c0_98, %c0_99] : memref<8x8x128xf32, #tpu.memory_space<vmem>>, vector<1x8x128xf32>
    %149 = vector.shape_cast %148 : vector<1x8x128xf32> to vector<8x128xf32>
    %150 = vector.shape_cast %146 : vector<8x128xf32> to vector<1x8x128xf32>
    tpu.vector_store %arg9[%147, %c0_98, %c0_99], %150 {strides = array<i32>} : memref<8x8x128xf32, #tpu.memory_space<vmem>>, vector<1x8x128xf32>,
    %c3_i32_100 = arith.constant 3 : i32
    %151 = arith.index_cast %c3_i32_100 : i32 to index
    %c0_101 = arith.constant 0 : index
    %c0_102 = arith.constant 0 : index
    %152 = vector.load %arg9[%151, %c0_101, %c0_102] : memref<8x8x128xf32, #tpu.memory_space<vmem>>, vector<1x8x128xf32>
    %153 = vector.shape_cast %152 : vector<1x8x128xf32> to vector<8x128xf32>
    %cst_103 = arith.constant dense<0.000000e+00> : vector<8x128xf32>
    %154 = tpu.matmul %146, %106, %cst_103 {dimension_numbers = #tpu.dot_dimension_numbers<[1], [0], [0], [1], [0, 0, 1, 1], [], []>} : vector<8x128xf32>, vector<128x128xf32>, vector<8x128xf32> -> vector<8x128xf32>
    %155 = arith.addf %153, %154 : vector<8x128xf32>
    %cst_104 = arith.constant 0.000000e+00 : f32
    %156 = vector.broadcast %cst_104 : f32 to vector<8x128xf32>
    %157 = arith.maximumf %155, %156 : vector<8x128xf32>
    %158 = arith.index_cast %c3_i32_100 : i32 to index
    %c0_105 = arith.constant 0 : index
    %c0_106 = arith.constant 0 : index
    %159 = vector.load %arg9[%158, %c0_105, %c0_106] : memref<8x8x128xf32, #tpu.memory_space<vmem>>, vector<1x8x128xf32>
    %160 = vector.shape_cast %159 : vector<1x8x128xf32> to vector<8x128xf32>
    %161 = vector.shape_cast %157 : vector<8x128xf32> to vector<1x8x128xf32>
    tpu.vector_store %arg9[%158, %c0_105, %c0_106], %161 {strides = array<i32>} : memref<8x8x128xf32, #tpu.memory_space<vmem>>, vector<1x8x128xf32>,
    %c4_i32_107 = arith.constant 4 : i32
    %162 = arith.index_cast %c4_i32_107 : i32 to index
    %c0_108 = arith.constant 0 : index
    %c0_109 = arith.constant 0 : index
    %163 = vector.load %arg9[%162, %c0_108, %c0_109] : memref<8x8x128xf32, #tpu.memory_space<vmem>>, vector<1x8x128xf32>
    %164 = vector.shape_cast %163 : vector<1x8x128xf32> to vector<8x128xf32>
    %cst_110 = arith.constant dense<0.000000e+00> : vector<8x128xf32>
    %165 = tpu.matmul %157, %106, %cst_110 {dimension_numbers = #tpu.dot_dimension_numbers<[1], [0], [0], [1], [0, 0, 1, 1], [], []>} : vector<8x128xf32>, vector<128x128xf32>, vector<8x128xf32> -> vector<8x128xf32>
    %166 = arith.addf %164, %165 : vector<8x128xf32>
    %cst_111 = arith.constant 0.000000e+00 : f32
    %167 = vector.broadcast %cst_111 : f32 to vector<8x128xf32>
    %168 = arith.maximumf %166, %167 : vector<8x128xf32>
    %169 = arith.index_cast %c4_i32_107 : i32 to index
    %c0_112 = arith.constant 0 : index
    %c0_113 = arith.constant 0 : index
    %170 = vector.load %arg9[%169, %c0_112, %c0_113] : memref<8x8x128xf32, #tpu.memory_space<vmem>>, vector<1x8x128xf32>
    %171 = vector.shape_cast %170 : vector<1x8x128xf32> to vector<8x128xf32>
    %172 = vector.shape_cast %168 : vector<8x128xf32> to vector<1x8x128xf32>
    tpu.vector_store %arg9[%169, %c0_112, %c0_113], %172 {strides = array<i32>} : memref<8x8x128xf32, #tpu.memory_space<vmem>>, vector<1x8x128xf32>,
    %c5_i32_114 = arith.constant 5 : i32
    %173 = arith.index_cast %c5_i32_114 : i32 to index
    %c0_115 = arith.constant 0 : index
    %c0_116 = arith.constant 0 : index
    %174 = vector.load %arg9[%173, %c0_115, %c0_116] : memref<8x8x128xf32, #tpu.memory_space<vmem>>, vector<1x8x128xf32>
    %175 = vector.shape_cast %174 : vector<1x8x128xf32> to vector<8x128xf32>
    %cst_117 = arith.constant dense<0.000000e+00> : vector<8x128xf32>
    %176 = tpu.matmul %168, %106, %cst_117 {dimension_numbers = #tpu.dot_dimension_numbers<[1], [0], [0], [1], [0, 0, 1, 1], [], []>} : vector<8x128xf32>, vector<128x128xf32>, vector<8x128xf32> -> vector<8x128xf32>
    %177 = arith.addf %175, %176 : vector<8x128xf32>
    %cst_118 = arith.constant 0.000000e+00 : f32
    %178 = vector.broadcast %cst_118 : f32 to vector<8x128xf32>
    %179 = arith.maximumf %177, %178 : vector<8x128xf32>
    %180 = arith.index_cast %c5_i32_114 : i32 to index
    %c0_119 = arith.constant 0 : index
    %c0_120 = arith.constant 0 : index
    %181 = vector.load %arg9[%180, %c0_119, %c0_120] : memref<8x8x128xf32, #tpu.memory_space<vmem>>, vector<1x8x128xf32>
    %182 = vector.shape_cast %181 : vector<1x8x128xf32> to vector<8x128xf32>
    %183 = vector.shape_cast %179 : vector<8x128xf32> to vector<1x8x128xf32>
    tpu.vector_store %arg9[%180, %c0_119, %c0_120], %183 {strides = array<i32>} : memref<8x8x128xf32, #tpu.memory_space<vmem>>, vector<1x8x128xf32>,
    %c6_i32_121 = arith.constant 6 : i32
    %184 = arith.index_cast %c6_i32_121 : i32 to index
    %c0_122 = arith.constant 0 : index
    %c0_123 = arith.constant 0 : index
    %185 = vector.load %arg9[%184, %c0_122, %c0_123] : memref<8x8x128xf32, #tpu.memory_space<vmem>>, vector<1x8x128xf32>
    %186 = vector.shape_cast %185 : vector<1x8x128xf32> to vector<8x128xf32>
    %cst_124 = arith.constant dense<0.000000e+00> : vector<8x128xf32>
    %187 = tpu.matmul %179, %106, %cst_124 {dimension_numbers = #tpu.dot_dimension_numbers<[1], [0], [0], [1], [0, 0, 1, 1], [], []>} : vector<8x128xf32>, vector<128x128xf32>, vector<8x128xf32> -> vector<8x128xf32>
    %188 = arith.addf %186, %187 : vector<8x128xf32>
    %cst_125 = arith.constant 0.000000e+00 : f32
    %189 = vector.broadcast %cst_125 : f32 to vector<8x128xf32>
    %190 = arith.maximumf %188, %189 : vector<8x128xf32>
    %191 = arith.index_cast %c6_i32_121 : i32 to index
    %c0_126 = arith.constant 0 : index
    %c0_127 = arith.constant 0 : index
    %192 = vector.load %arg9[%191, %c0_126, %c0_127] : memref<8x8x128xf32, #tpu.memory_space<vmem>>, vector<1x8x128xf32>
    %193 = vector.shape_cast %192 : vector<1x8x128xf32> to vector<8x128xf32>
    %194 = vector.shape_cast %190 : vector<8x128xf32> to vector<1x8x128xf32>
    tpu.vector_store %arg9[%191, %c0_126, %c0_127], %194 {strides = array<i32>} : memref<8x8x128xf32, #tpu.memory_space<vmem>>, vector<1x8x128xf32>,
    %c7_i32_128 = arith.constant 7 : i32
    %195 = arith.index_cast %c7_i32_128 : i32 to index
    %c0_129 = arith.constant 0 : index
    %c0_130 = arith.constant 0 : index
    %196 = vector.load %arg9[%195, %c0_129, %c0_130] : memref<8x8x128xf32, #tpu.memory_space<vmem>>, vector<1x8x128xf32>
    %197 = vector.shape_cast %196 : vector<1x8x128xf32> to vector<8x128xf32>
    %cst_131 = arith.constant dense<0.000000e+00> : vector<8x128xf32>
    %198 = tpu.matmul %190, %106, %cst_131 {dimension_numbers = #tpu.dot_dimension_numbers<[1], [0], [0], [1], [0, 0, 1, 1], [], []>} : vector<8x128xf32>, vector<128x128xf32>, vector<8x128xf32> -> vector<8x128xf32>
    %199 = arith.addf %197, %198 : vector<8x128xf32>
    %cst_132 = arith.constant 0.000000e+00 : f32
    %200 = vector.broadcast %cst_132 : f32 to vector<8x128xf32>
    %201 = arith.maximumf %199, %200 : vector<8x128xf32>
    %202 = arith.index_cast %c7_i32_128 : i32 to index
    %c0_133 = arith.constant 0 : index
    %c0_134 = arith.constant 0 : index
    %203 = vector.load %arg9[%202, %c0_133, %c0_134] : memref<8x8x128xf32, #tpu.memory_space<vmem>>, vector<1x8x128xf32>
    %204 = vector.shape_cast %203 : vector<1x8x128xf32> to vector<8x128xf32>
    %205 = vector.shape_cast %201 : vector<8x128xf32> to vector<1x8x128xf32>
    tpu.vector_store %arg9[%202, %c0_133, %c0_134], %205 {strides = array<i32>} : memref<8x8x128xf32, #tpu.memory_space<vmem>>, vector<1x8x128xf32>,
    %c8_i32_135 = arith.constant 8 : i32
    %c0_136 = arith.constant 0 : index
    %c0_137 = arith.constant 0 : index
    %206 = vector.load %arg4[%c0_136, %c0_137] : memref<128x128xf32, #tpu.memory_space<vmem>>, vector<128x128xf32>
    %cst_138 = arith.constant dense<0.000000e+00> : vector<8x128xf32>
    %207 = tpu.matmul %201, %206, %cst_138 {dimension_numbers = #tpu.dot_dimension_numbers<[1], [0], [0], [1], [0, 0, 1, 1], [], []>} : vector<8x128xf32>, vector<128x128xf32>, vector<8x128xf32> -> vector<8x128xf32>
    %c0_139 = arith.constant 0 : index
    %c0_140 = arith.constant 0 : index
    %208 = vector.load %arg5[%c0_139, %c0_140] : memref<8x128xf32, #tpu.memory_space<vmem>>, vector<8x128xf32>
    %209 = arith.addf %207, %208 : vector<8x128xf32>
    %cst_141 = arith.constant 0.000000e+00 : f32
    %210 = vector.broadcast %cst_141 : f32 to vector<8x128xf32>
    %211 = arith.maximumf %209, %210 : vector<8x128xf32>
    %c0_142 = arith.constant 0 : index
    %c0_143 = arith.constant 0 : index
    %212 = vector.load %arg6[%c0_142, %c0_143] : memref<128x128xf32, #tpu.memory_space<vmem>>, vector<128x128xf32>
    %cst_144 = arith.constant dense<0.000000e+00> : vector<8x128xf32>
    %213 = tpu.matmul %211, %212, %cst_144 {dimension_numbers = #tpu.dot_dimension_numbers<[1], [0], [0], [1], [0, 0, 1, 1], [], []>} : vector<8x128xf32>, vector<128x128xf32>, vector<8x128xf32> -> vector<8x128xf32>
    %c0_145 = arith.constant 0 : index
    %c0_146 = arith.constant 0 : index
    %214 = vector.load %arg7[%c0_145, %c0_146] : memref<8x128xf32, #tpu.memory_space<vmem>>, vector<8x128xf32>
    %215 = arith.addf %213, %214 : vector<8x128xf32>
    %cst_147 = arith.constant 0.000000e+00 : f32
    %216 = vector.broadcast %cst_147 : f32 to vector<8x128xf32>
    %217 = arith.maximumf %215, %216 : vector<8x128xf32>
    %218 = tpu.iota {dimensions = array<i32: 1>} : vector<8x128xi32>
    %c5_i32_148 = arith.constant 5 : i32
    %219 = vector.broadcast %c5_i32_148 : i32 to vector<8x128xi32>
    %220 = arith.cmpi slt, %218, %219 : vector<8x128xi32>
    %cst_149 = arith.constant -1.000000e+30 : f32
    %221 = vector.broadcast %cst_149 : f32 to vector<8x128xf32>
    %222 = arith.select %220, %217, %221 : vector<8x128xi1>, vector<8x128xf32>
    %cst_150 = arith.constant dense<0xFF800000> : vector<8xf32>
    %223 = vector.multi_reduction <maximumf>, %222, %cst_150 [1] : vector<8x128xf32> to vector<8xf32>
    %224 = vector.shape_cast %223 : vector<8xf32> to vector<8x1xf32>
    %225 = vector.broadcast %224 : vector<8x1xf32> to vector<8x128xf32>
    %226 = arith.subf %222, %225 : vector<8x128xf32>
    %227 = math.exp %226 : vector<8x128xf32>
    %cst_151 = arith.constant dense<0.000000e+00> : vector<8xf32>
    %228 = vector.multi_reduction <add>, %227, %cst_151 [1] : vector<8x128xf32> to vector<8xf32>
    %229 = vector.shape_cast %228 : vector<8xf32> to vector<8x1xf32>
    %230 = math.log %229 : vector<8x1xf32>
    %231 = arith.addf %230, %224 : vector<8x1xf32>
    %232 = vector.broadcast %231 : vector<8x1xf32> to vector<8x128xf32>
    %233 = arith.subf %217, %232 : vector<8x128xf32>
    %c0_152 = arith.constant 0 : index
    %c0_153 = arith.constant 0 : index
    %234 = vector.load %arg8[%c0_152, %c0_153] : memref<8x128xf32, #tpu.memory_space<vmem>>, vector<8x128xf32>
    tpu.vector_store %arg8[%c0_152, %c0_153], %233 {strides = array<i32>} : memref<8x128xf32, #tpu.memory_space<vmem>>, vector<8x128xf32>,
    return
  }
}

</mosaic_0001>

<bundles_post_ra>
// kernel: rnn_module_forward.1
= control target key start
LH: loop header
LB: loop body
LE: loop exit
PB: predicated region body
PF: predicated region fallthrough
CT: control target
= control target key end

     0   :  { %13 = vsyncpa [#allocation4], 0  ;;  %s4074_s0 = inlined_call_operand.vmem [shape: f32[8,8,128], index: 0, kind: input, shape index: {}]   ;;  %s4075_s1 = inlined_call_operand.hbm [shape: f32[2,128,128], index: 1, kind: input, shape index: {}]   ;;  %s4076_s2 = inlined_call_operand.hbm [shape: f32[2,128,128], index: 2, kind: input, shape index: {}]   ;;  %s4077_s3 = inlined_call_operand.vmem [shape: f32[2,8,128], index: 3, kind: input, shape index: {}]   ;;  %s4078_s4 = inlined_call_operand.hbm [shape: f32[128,128], index: 4, kind: input, shape index: {}]   ;;  %s4079_s5 = inlined_call_operand.vmem [shape: f32[8,128], index: 5, kind: input, shape index: {}]   ;;  %s4080_s6 = inlined_call_operand.hbm [shape: f32[128,128], index: 6, kind: input, shape index: {}]   ;;  %s4081_s7 = inlined_call_operand.vmem [shape: f32[8,128], index: 7, kind: input, shape index: {}]   ;;  %s4082_s8 = inlined_call_operand.vmem [shape: f32[8,128], index: 8, kind: output, shape index: {}]  }
   0x1   :  { %14 = vsyncpa [#allocation6], 0 }
   0x2   :  { %15 = vsyncpa [#allocation9], 0  ;;  %s3477_s27 = smov [#allocation5]   ;;  %s3478_s29 = smov [#allocation3]  }
   0x3   :  { %s35_s28 = sshll.u32 %s3477_s27, 4  ;;  %s23_s30 = sshll.u32 %s3478_s29, 4  ;;  %s36_s28 = int_to_ptr.vmem [resolvable:$true] %s35_s28  ;;  %s3531_s30 = int_to_ptr.vmem [resolvable:$true] %s23_s30 }
   0x4   :  { %s3383_s11 = scalar_lea.hbm %s4076_s2, 4096 }
   0x5   :  { %p3384_p0 = scmp.ne.s32.totalorder %s4076_s2, %s3383_s11  ;;  %p3387_p1 = scmp.lt.u32.totalorder %s3383_s11, %s4076_s2 }
   0x7   :  { %p3389_p2 = pnand %p3387_p1, %p3384_p0 }
   0x9   :  { %3392 = shalt.err (!%p3389_p2)
}
   0xa   :  { %s3393_s16 = scalar_lea.vmem %s36_s28, 4096  ;;  %p3398_p4 = scmp.lt.s32.totalorder %s36_s28, %s36_s28 }
   0xb   :  { %p3394_p3 = scmp.ne.s32.totalorder %s36_s28, %s3393_s16  ;;  %p3399_p5 = scmp.lt.s32.totalorder %s3393_s16, %s3393_s16 }
   0xd   :  { %p3400_p6 = por %p3399_p5, %p3398_p4 }
   0xf   :  { %p3401_p7 = pnand %p3400_p6, %p3394_p3 }
  0x11   :  { %3404 = shalt.err (!%p3401_p7)
}
  0x12   :  { %s3479_s17 = smov 128   ;;  %s3480_s18 = smov 8  }
  0x13   :  { %41 = dma.hbm_to_vmem [thread:$0]  %s4076_s2, 4096, %s36_s28, [#allocation6], %s3479_s17, %s3479_s17, %s3480_s18  }
  0x14   :  { %s3405_s23 = scalar_lea.hbm %s4075_s1, 4096 }
  0x15   :  { %p3406_p8 = scmp.ne.s32.totalorder %s4075_s1, %s3405_s23  ;;  %p3409_p9 = scmp.lt.u32.totalorder %s3405_s23, %s4075_s1 }
  0x17   :  { %p3411_p10 = pnand %p3409_p9, %p3406_p8 }
  0x19   :  { %3414 = shalt.err (!%p3411_p10)
}
  0x1a   :  { %s3415_s29 = scalar_lea.vmem %s3531_s30, 4096  ;;  %p3420_p12 = scmp.lt.s32.totalorder %s3531_s30, %s3531_s30 }
  0x1b   :  { %p3416_p11 = scmp.ne.s32.totalorder %s3531_s30, %s3415_s29  ;;  %p3421_p13 = scmp.lt.s32.totalorder %s3415_s29, %s3415_s29 }
  0x1d   :  { %p3422_p0 = por %p3421_p13, %p3420_p12 }
  0x1f   :  { %p3423_p1 = pnand %p3422_p0, %p3416_p11 }
  0x21   :  { %3426 = shalt.err (!%p3423_p1)
}
  0x22   :  { %29 = dma.hbm_to_vmem [thread:$0]  %s4075_s1, 4096, %s3531_s30, [#allocation4], %s3479_s17, %s3479_s17, %s3480_s18  }
  0x23   :  { %s3481_s9 = smov [#allocation7]   ;;  %s3482_s11 = smov [#allocation8]  }
  0x24   :  { %s49_s10 = sshll.u32 %s3481_s9, 4  ;;  %s63_s12 = sshll.u32 %s3482_s11, 4  ;;  %s50_s10 = int_to_ptr.vmem [resolvable:$true] %s49_s10  ;;  %s3568_s12 = int_to_ptr.vmem [resolvable:$true] %s63_s12 }
  0x25   :  { %s3427_s15 = scalar_lea.hbm %s4078_s4, 2048 }
  0x26   :  { %p3428_p2 = scmp.ne.s32.totalorder %s4078_s4, %s3427_s15  ;;  %p3431_p3 = scmp.lt.u32.totalorder %s3427_s15, %s4078_s4 }
  0x28   :  { %p3433_p4 = pnand %p3431_p3, %p3428_p2 }
  0x2a   :  { %3436 = shalt.err (!%p3433_p4)
}
  0x2b   :  { %s3437_s1 = scalar_lea.vmem %s50_s10, 2048  ;;  %p3442_p6 = scmp.lt.s32.totalorder %s50_s10, %s50_s10 }
  0x2c   :  { %p3438_p5 = scmp.ne.s32.totalorder %s50_s10, %s3437_s1  ;;  %p3443_p7 = scmp.lt.s32.totalorder %s3437_s1, %s3437_s1 }
  0x2e   :  { %p3444_p8 = por %p3443_p7, %p3442_p6 }
  0x30   :  { %p3445_p9 = pnand %p3444_p8, %p3438_p5 }
  0x32   :  { %3448 = shalt.err (!%p3445_p9)
}
  0x33   :  { %55 = dma.hbm_to_vmem [thread:$0]  %s4078_s4, 2048, %s50_s10, [#allocation6], %s3479_s17, %s3479_s17, %s3480_s18  }
  0x34   :  { %s3449_s25 = scalar_lea.hbm %s4080_s6, 2048 }
  0x35   :  { %p3450_p10 = scmp.ne.s32.totalorder %s4080_s6, %s3449_s25  ;;  %p3453_p11 = scmp.lt.u32.totalorder %s3449_s25, %s4080_s6 }
  0x37   :  { %p3455_p12 = pnand %p3453_p11, %p3450_p10 }
  0x39   :  { %3458 = shalt.err (!%p3455_p12)
}
  0x3a   :  { %s3459_s28 = scalar_lea.vmem %s3568_s12, 2048  ;;  %p3464_p0 = scmp.lt.s32.totalorder %s3568_s12, %s3568_s12 }
  0x3b   :  { %p3460_p13 = scmp.ne.s32.totalorder %s3568_s12, %s3459_s28  ;;  %p3465_p1 = scmp.lt.s32.totalorder %s3459_s28, %s3459_s28 }
  0x3d   :  { %p3466_p2 = por %p3465_p1, %p3464_p0 }
  0x3f   :  { %p3467_p3 = pnand %p3466_p2, %p3460_p13 }
  0x41   :  { %3470 = shalt.err (!%p3467_p3)
}
  0x42   :  { %69 = dma.hbm_to_vmem [thread:$0]  %s4080_s6, 2048, %s3568_s12, [#allocation9], %s3479_s17, %s3479_s17, %s3480_s18  }
  0x43   :  { %3471 = dma.done.wait [#allocation4], 4096  }
  0x44   :  { %3472 = vsyncadd [#allocation4], 4294963200 }
  0x45   :  { %3473 = dma.done.wait [#allocation6], 6144  }
  0x46   :  { %3474 = vsyncadd [#allocation6], 4294961152 }
  0x47   :  { %3475 = dma.done.wait [#allocation9], 2048  }
  0x48   :  { %3476 = vsyncadd [#allocation9], 4294965248  ;;  %v3483_v0 = vmov 0.0|0.0   ;;  %vm3484_vm0 = vmmov 0   ;;  %v3485_v1 = vmov 0.0   ;;  %v84_v2 = vld [vmem:[#allocation3] sm:$0xff] }
  0x49   :  { %2906 = vmatprep.subr.bf16.mxu1 %v3483_v0  ;;  %2232 = vmatprep.mubr.msk.f32.mxu1 %vm3484_vm0, %v3485_v1  ;;  %v85_v3 = vld [vmem:[#allocation3 + $0x8] sm:$0xff]  ;;  %v100_v4 = vld [vmem:[#allocation5] sm:$0xff]  ;;  %v86_v7 = vld [vmem:[#allocation3 + $0x10] sm:$0xff] }
  0x4a   :  { %v2874_v5 = vpack.c.bf16 %v85_v3, %v84_v2  ;;  %v101_v6 = vld [vmem:[#allocation5 + $0x8] sm:$0xff]  ;;  %v87_v8 = vld [vmem:[#allocation3 + $0x18] sm:$0xff]  ;;  %v102_v11 = vld [vmem:[#allocation5 + $0x10] sm:$0xff] }
  0x4b   :  { %v3608_v9 = vpack.c.bf16 %v101_v6, %v100_v4  ;;  %v2878_v10 = vpack.c.bf16 %v87_v8, %v86_v7  ;;  %v103_v12 = vld [vmem:[#allocation5 + $0x18] sm:$0xff]  ;;  %v88_v13 = vld [vmem:[#allocation3 + $0x20] sm:$0xff]  ;;  %v89_v14 = vld [vmem:[#allocation3 + $0x28] sm:$0xff] }
  0x4c   :  { %2875 = vmatprep.subr.bf16.mxu0 %v2874_v5  ;;  %v3611_v15 = vpack.c.bf16 %v103_v12, %v102_v11  ;;  %v2882_v16 = vpack.c.bf16 %v89_v14, %v88_v13  ;;  %v104_v17 = vld [vmem:[#allocation5 + $0x20] sm:$0xff]  ;;  %v105_v18 = vld [vmem:[#allocation5 + $0x28] sm:$0xff]  ;;  %v90_v19 = vld [vmem:[#allocation3 + $0x30] sm:$0xff] }
  0x4d   :  { %2877 = vmatpush3.bf16.msra.mxu0 %v2874_v5  ;;  %2908 = vmatpush3.bf16.msra.mxu1 %v3608_v9  ;;  %v91_v20 = vld [vmem:[#allocation3 + $0x38] sm:$0xff]  ;;  %v3615_v21 = vpack.c.bf16 %v105_v18, %v104_v17  ;;  %v106_v23 = vld [vmem:[#allocation5 + $0x30] sm:$0xff]  ;;  %v92_v25 = vld [vmem:[#allocation3 + $0x40] sm:$0xff] }
  0x4e   :  { %2879 = vmatprep.subr.bf16.mxu0 %v2878_v10  ;;  %2909 = vmatprep.subr.bf16.mxu1 %v3483_v0  ;;  %v2886_v22 = vpack.c.bf16 %v91_v20, %v90_v19  ;;  %v107_v24 = vld [vmem:[#allocation5 + $0x38] sm:$0xff]  ;;  %v93_v26 = vld [vmem:[#allocation3 + $0x48] sm:$0xff]  ;;  %v117_v27 = vld [vmem:[%s4074_s0] sm:$0xff] }
  0x4f   :  { %2188 = vmatprep.mubr.f32.mxu0 %v117_v27  ;;  %v3622_v28 = vpack.c.bf16 %v107_v24, %v106_v23  ;;  %v2890_v29 = vpack.c.bf16 %v93_v26, %v92_v25  ;;  %v108_v30 = vld [vmem:[#allocation5 + $0x40] sm:$0xff]  ;;  %v109_v31 = vld [vmem:[#allocation5 + $0x48] sm:$0xff]  ;;  %v94_v32 = vld [vmem:[#allocation3 + $0x50] sm:$0xff] }
  0x50   :  { %v95_v33 = vld [vmem:[#allocation3 + $0x58] sm:$0xff]  ;;  %v3626_v34 = vpack.c.bf16 %v109_v31, %v108_v30  ;;  %v110_v36 = vld [vmem:[#allocation5 + $0x50] sm:$0xff]  ;;  %v96_v38 = vld [vmem:[#allocation3 + $0x60] sm:$0xff] }
  0x51   :  { %2881 = vmatpush3.bf16.msra.mxu0 %v2878_v10  ;;  %2911 = vmatpush3.bf16.msra.mxu1 %v3611_v15  ;;  %v2894_v35 = vpack.c.bf16 %v95_v33, %v94_v32  ;;  %v111_v37 = vld [vmem:[#allocation5 + $0x58] sm:$0xff]  ;;  %v97_v39 = vld [vmem:[#allocation3 + $0x68] sm:$0xff]  ;;  %v112_v42 = vld [vmem:[#allocation5 + $0x60] sm:$0xff] }
  0x52   :  { %2883 = vmatprep.subr.bf16.mxu0 %v2882_v16  ;;  %2912 = vmatprep.subr.bf16.mxu1 %v3483_v0  ;;  %v3630_v40 = vpack.c.bf16 %v111_v37, %v110_v36  ;;  %v2898_v41 = vpack.c.bf16 %v97_v39, %v96_v38  ;;  %v113_v43 = vld [vmem:[#allocation5 + $0x68] sm:$0xff]  ;;  %v98_v44 = vld [vmem:[#allocation3 + $0x70] sm:$0xff]  ;;  %v99_v45 = vld [vmem:[#allocation3 + $0x78] sm:$0xff] }
  0x53   :  { %v3634_v46 = vpack.c.bf16 %v113_v43, %v112_v42  ;;  %v2902_v47 = vpack.c.bf16 %v99_v45, %v98_v44  ;;  %v114_v48 = vld [vmem:[#allocation5 + $0x70] sm:$0xff]  ;;  %v115_v49 = vld [vmem:[#allocation5 + $0x78] sm:$0xff]  ;;  %v118_v51 = vld [vmem:[%s4074_s0 + $0x8] sm:$0xff] }
  0x54   :  { %v3638_v50 = vpack.c.bf16 %v115_v49, %v114_v48  ;;  %v119_v52 = vld [vmem:[%s4074_s0 + $0x10] sm:$0xff]  ;;  %v120_v53 = vld [vmem:[%s4074_s0 + $0x18] sm:$0xff]  ;;  %v121_v54 = vld [vmem:[%s4074_s0 + $0x20] sm:$0xff] }
  0x55   :  { %2885 = vmatpush3.bf16.msra.mxu0 %v2882_v16  ;;  %2914 = vmatpush3.bf16.msra.mxu1 %v3615_v21  ;;  %v122_v55 = vld [vmem:[%s4074_s0 + $0x28] sm:$0xff]  ;;  %v123_v56 = vld [vmem:[%s4074_s0 + $0x30] sm:$0xff]  ;;  %v124_v57 = vld [vmem:[%s4074_s0 + $0x38] sm:$0xff] }
  0x56   :  { %2887 = vmatprep.subr.bf16.mxu0 %v2886_v22  ;;  %2915 = vmatprep.subr.bf16.mxu1 %v3483_v0  ;;  %v3705_v58 = vld [vmem:[%s4077_s3] sm:$0xff]  ;;  %v849_v36 = vld [vmem:[#allocation3 + $0x98] sm:$0xff]  ;;  %v851_v42 = vld [vmem:[#allocation3 + $0xa8] sm:$0xff] }
  0x57   :  { %v852_v44 = vld [vmem:[#allocation3 + $0xb0] sm:$0xff]  ;;  %v853_v45 = vld [vmem:[#allocation3 + $0xb8] sm:$0xff]  ;;  %v855_v48 = vld [vmem:[#allocation3 + $0xc8] sm:$0xff] }
  0x59   :  { %2889 = vmatpush3.bf16.msra.mxu0 %v2886_v22  ;;  %2917 = vmatpush3.bf16.msra.mxu1 %v3622_v28 }
  0x5a   :  { %2891 = vmatprep.subr.bf16.mxu0 %v2890_v29  ;;  %2918 = vmatprep.subr.bf16.mxu1 %v3483_v0 }
  0x5d   :  { %2893 = vmatpush3.bf16.msra.mxu0 %v2890_v29  ;;  %2920 = vmatpush3.bf16.msra.mxu1 %v3626_v34 }
  0x5e   :  { %2895 = vmatprep.subr.bf16.mxu0 %v2894_v35  ;;  %2921 = vmatprep.subr.bf16.mxu1 %v3483_v0 }
  0x61   :  { %2897 = vmatpush3.bf16.msra.mxu0 %v2894_v35  ;;  %2923 = vmatpush3.bf16.msra.mxu1 %v3630_v40  ;;  %v848_v35 = vld [vmem:[#allocation3 + $0x90] sm:$0xff] }
  0x62   :  { %2899 = vmatprep.subr.bf16.mxu0 %v2898_v41  ;;  %2924 = vmatprep.subr.bf16.mxu1 %v3483_v0 }
  0x65   :  { %2901 = vmatpush3.bf16.msra.mxu0 %v2898_v41  ;;  %2926 = vmatpush3.bf16.msra.mxu1 %v3634_v46  ;;  %v850_v41 = vld [vmem:[#allocation3 + $0xa0] sm:$0xff] }
  0x66   :  { %2903 = vmatprep.subr.bf16.mxu0 %v2902_v47  ;;  %2927 = vmatprep.subr.bf16.mxu1 %v3483_v0  ;;  %v3106_v43 = vpack.c.bf16 %v851_v42, %v850_v41 }
  0x69   :  { %2905 = vmatpush3.bf16.msra.mxu0 %v2902_v47  ;;  %2929 = vmatpush3.bf16.msra.mxu1 %v3638_v50  ;;  %v854_v47 = vld [vmem:[#allocation3 + $0xc0] sm:$0xff] }
  0x6a   :  { %2930 = vmatprep.subr.bf16.mxu0 %v3483_v0  ;;  %2954 = vmatprep.subr.bf16.mxu1 %v3483_v0  ;;  %v3114_v49 = vpack.c.bf16 %v855_v48, %v854_v47 }
  0x6c   :  { %2189 = vmatmul.mubr.f32.vlgmr.msra.gmra.mrb[0].mxu0 %v118_v51  ;;  %2233 = vmatmul.mubr.f32.vlgmr.msra.gmra.mrb[0].mxu1 %v3485_v1  ;;  %v857_v51 = vld [vmem:[#allocation3 + $0xd8] sm:$0xff] }
  0x6d   :  { %2932 = vmatpush3.bf16.msra.mxu0 %v3608_v9  ;;  %2191 = vmatprep.mubr.f32.mxu0 %v119_v52 }
  0x6e   :  { %2933 = vmatprep.subr.bf16.mxu0 %v3483_v0  ;;  %2956 = vmatpush3.bf16.msra.mxu1 %v3608_v9 }
  0x6f   :  { %2957 = vmatprep.subr.bf16.mxu1 %v3483_v0  ;;  %2302 = vmatprep.mubr.msk.f32.mxu1 %vm3484_vm0, %v3485_v1 }
  0x70   :  { %2192 = vmatmul.mubr.f32.gmra.mrb[2].mxu0 %v120_v53  ;;  %v858_v53 = vld [vmem:[#allocation3 + $0xe0] sm:$0xff] }
  0x71   :  { %2935 = vmatpush3.bf16.msra.mxu0 %v3611_v15  ;;  %2194 = vmatprep.mubr.f32.mxu0 %v121_v54  ;;  %v859_v54 = vld [vmem:[#allocation3 + $0xe8] sm:$0xff] }
  0x72   :  { %2936 = vmatprep.subr.bf16.mxu0 %v3483_v0  ;;  %2959 = vmatpush3.bf16.msra.mxu1 %v3611_v15 }
  0x73   :  { %2960 = vmatprep.subr.bf16.mxu1 %v3483_v0 }
  0x74   :  { %2195 = vmatmul.mubr.f32.gmra.mrb[4].mxu0 %v122_v55  ;;  %v3122_v55 = vpack.c.bf16 %v859_v54, %v858_v53 }
  0x75   :  { %2938 = vmatpush3.bf16.msra.mxu0 %v3615_v21  ;;  %2197 = vmatprep.mubr.f32.mxu0 %v123_v56  ;;  %v860_v56 = vld [vmem:[#allocation3 + $0xf0] sm:$0xff] }
  0x76   :  { %2939 = vmatprep.subr.bf16.mxu0 %v3483_v0  ;;  %2962 = vmatpush3.bf16.msra.mxu1 %v3615_v21 }
  0x77   :  { %2963 = vmatprep.subr.bf16.mxu1 %v3483_v0 }
  0x78   :  { %2198 = vmatmul.mubr.f32.gmra.mrb[6].mxu0 %v124_v57  ;;  %v861_v57 = vld [vmem:[#allocation3 + $0xf8] sm:$0xff] }
  0x79   :  { %2941 = vmatpush3.bf16.msra.mxu0 %v3622_v28  ;;  %2267 = vmatprep.mubr.msk.f32.mxu0 %vm3484_vm0, %v3485_v1 }
  0x7a   :  { %2942 = vmatprep.subr.bf16.mxu0 %v3483_v0  ;;  %2965 = vmatpush3.bf16.msra.mxu1 %v3622_v28 }
  0x7b   :  { %2966 = vmatprep.subr.bf16.mxu1 %v3483_v0 }
  0x7d   :  { %2944 = vmatpush3.bf16.msra.mxu0 %v3626_v34 }
  0x7e   :  { %2945 = vmatprep.subr.bf16.mxu0 %v3483_v0  ;;  %2968 = vmatpush3.bf16.msra.mxu1 %v3626_v34 }
  0x7f   :  { %2969 = vmatprep.subr.bf16.mxu1 %v3483_v0 }
  0x81   :  { %2947 = vmatpush3.bf16.msra.mxu0 %v3630_v40 }
  0x82   :  { %2948 = vmatprep.subr.bf16.mxu0 %v3483_v0  ;;  %2971 = vmatpush3.bf16.msra.mxu1 %v3630_v40 }
  0x83   :  { %2972 = vmatprep.subr.bf16.mxu1 %v3483_v0 }
  0x85   :  { %2950 = vmatpush3.bf16.msra.mxu0 %v3634_v46 }
  0x86   :  { %2951 = vmatprep.subr.bf16.mxu0 %v3483_v0  ;;  %2974 = vmatpush3.bf16.msra.mxu1 %v3634_v46 }
  0x87   :  { %2975 = vmatprep.subr.bf16.mxu1 %v3483_v0 }
  0x89   :  { %2953 = vmatpush3.bf16.msra.mxu0 %v3638_v50 }
  0x8a   :  { %2977 = vmatpush3.bf16.msra.mxu1 %v3638_v50  ;;  %2978 = vmatprep.subr.bf16.mxu0 %v3483_v0 }
  0x8b   :  { %3002 = vmatprep.subr.bf16.mxu1 %v3483_v0 }
 0x13f   :  { %v2190_v59 = vpop.f32.mrb[0].mxu0  ;;  %v313_v60 = vpop.f32.mrb[0].mxu1 }
 0x140   :  { %v191_v61 = vpop.f32.mrb[1].mxu0  ;;  %v2234_v62 = vpop.f32.mrb[1].mxu1  ;;  %v231_v11 = vadd.f32 %v2190_v59, %v3705_v58  ;;  %v3126_v59 = vpack.c.bf16 %v861_v57, %v860_v56 }
 0x141   :  { %v230_v63 = vadd.f32 %v191_v61, %v3705_v58  ;;  %v864_v61 = vld [vmem:[#allocation5 + $0x88] sm:$0xff] }
 0x143   :  { %v3708_v2 = vadd.f32 %v313_v60, %v230_v63  ;;  %v3710_v3 = vpop.f32.mrb[2].mxu0  ;;  %v863_v60 = vld [vmem:[#allocation5 + $0x80] sm:$0xff]  ;;  %v865_v63 = vld [vmem:[#allocation5 + $0x90] sm:$0xff] }
 0x144   :  { %v201_v4 = vpop.f32.mrb[3].mxu0  ;;  %v233_v23 = vadd.f32 %v3710_v3, %v3705_v58  ;;  %v3851_v62 = vpack.c.bf16 %v864_v61, %v863_v60 }
 0x145   :  { %v318_v5 = vmax.f32 %v3708_v2, 0.0  ;;  %v232_v17 = vadd.f32 %v201_v4, %v3705_v58  ;;  %v866_v2 = vld [vmem:[#allocation5 + $0x98] sm:$0xff]  ;;  %v867_v4 = vld [vmem:[#allocation5 + $0xa0] sm:$0xff] }
 0x146   :  { %v3855_v3 = vpack.c.bf16 %v866_v2, %v865_v63 }
 0x147   :  { %2268 = vmatmul.mubr.f32.vlgmr.msra.gmra.mrb[8].mxu0 %v318_v5  ;;  %v3715_v6 = vpop.f32.mrb[4].mxu0 }
 0x148   :  { %v3717_v7 = vpop.f32.mrb[5].mxu0  ;;  %2980 = vmatpush3.bf16.msra.mxu0 %v3608_v9  ;;  %2337 = vmatprep.mubr.msk.f32.mxu0 %vm3484_vm0, %v3485_v1 }
 0x149   :  { %2981 = vmatprep.subr.bf16.mxu0 %v3483_v0  ;;  %v234_v29 = vadd.f32 %v3717_v7, %v3705_v58  ;;  %v869_v7 = vld [vmem:[#allocation5 + $0xb0] sm:$0xff] }
 0x14b   :  { %v3737_v8 = vpop.f32.mrb[6].mxu0 }
 0x14c   :  { %2983 = vmatpush3.bf16.msra.mxu0 %v3611_v15  ;;  %v3739_v10 = vpop.f32.mrb[7].mxu0 }
 0x14d   :  { %2984 = vmatprep.subr.bf16.mxu0 %v3483_v0 }
 0x150   :  { %2986 = vmatpush3.bf16.msra.mxu0 %v3615_v21 }
 0x151   :  { %2987 = vmatprep.subr.bf16.mxu0 %v3483_v0 }
 0x154   :  { %2989 = vmatpush3.bf16.msra.mxu0 %v3622_v28 }
 0x155   :  { %2990 = vmatprep.subr.bf16.mxu0 %v3483_v0 }
 0x158   :  { %2992 = vmatpush3.bf16.msra.mxu0 %v3626_v34 }
 0x159   :  { %2993 = vmatprep.subr.bf16.mxu0 %v3483_v0 }
 0x15c   :  { %2995 = vmatpush3.bf16.msra.mxu0 %v3630_v40 }
 0x15d   :  { %2996 = vmatprep.subr.bf16.mxu0 %v3483_v0 }
 0x160   :  { %2998 = vmatpush3.bf16.msra.mxu0 %v3634_v46 }
 0x161   :  { %2999 = vmatprep.subr.bf16.mxu0 %v3483_v0 }
 0x164   :  { %3001 = vmatpush3.bf16.msra.mxu0 %v3638_v50 }
 0x165   :  { %3026 = vmatprep.subr.bf16.mxu0 %v3483_v0 }
 0x21a   :  { %v388_v12 = vpop.f32.mrb[8].mxu0 }
 0x21b   :  { %v3742_v13 = vadd.f32 %v388_v12, %v231_v11  ;;  %v2269_v14 = vpop.f32.mrb[9].mxu0  ;;  %v870_v11 = vld [vmem:[#allocation5 + $0xb8] sm:$0xff] }
 0x21c   :  { %v3863_v12 = vpack.c.bf16 %v870_v11, %v869_v7  ;;  %v872_v14 = vld [vmem:[#allocation5 + $0xc8] sm:$0xff] }
 0x21d   :  { %v393_v16 = vmax.f32 %v3742_v13, 0.0  ;;  %v871_v13 = vld [vmem:[#allocation5 + $0xc0] sm:$0xff] }
 0x21f   :  { %2303 = vmatmul.mubr.f32.vlgmr.msra.gmra.mrb[2].mxu1 %v393_v16 }
 0x220   :  { %3004 = vmatpush3.bf16.msra.mxu1 %v3608_v9  ;;  %2372 = vmatprep.mubr.msk.f32.mxu1 %vm3484_vm0, %v3485_v1 }
 0x221   :  { %3005 = vmatprep.subr.bf16.mxu1 %v3483_v0 }
 0x224   :  { %3007 = vmatpush3.bf16.msra.mxu1 %v3611_v15 }
 0x225   :  { %3008 = vmatprep.subr.bf16.mxu1 %v3483_v0 }
 0x228   :  { %3010 = vmatpush3.bf16.msra.mxu1 %v3615_v21 }
 0x229   :  { %3011 = vmatprep.subr.bf16.mxu1 %v3483_v0 }
 0x22c   :  { %3013 = vmatpush3.bf16.msra.mxu1 %v3622_v28 }
 0x22d   :  { %3014 = vmatprep.subr.bf16.mxu1 %v3483_v0 }
 0x230   :  { %3016 = vmatpush3.bf16.msra.mxu1 %v3626_v34 }
 0x231   :  { %3017 = vmatprep.subr.bf16.mxu1 %v3483_v0 }
 0x234   :  { %3019 = vmatpush3.bf16.msra.mxu1 %v3630_v40 }
 0x235   :  { %3020 = vmatprep.subr.bf16.mxu1 %v3483_v0 }
 0x238   :  { %3022 = vmatpush3.bf16.msra.mxu1 %v3634_v46 }
 0x239   :  { %3023 = vmatprep.subr.bf16.mxu1 %v3483_v0 }
 0x23c   :  { %3025 = vmatpush3.bf16.msra.mxu1 %v3638_v50 }
 0x23d   :  { %3050 = vmatprep.subr.bf16.mxu1 %v3483_v0 }
 0x2f2   :  { %v463_v18 = vpop.f32.mrb[2].mxu1 }
 0x2f3   :  { %v3766_v19 = vadd.f32 %v463_v18, %v232_v17  ;;  %v2304_v20 = vpop.f32.mrb[3].mxu1  ;;  %v873_v17 = vld [vmem:[#allocation5 + $0xd0] sm:$0xff]  ;;  %v874_v18 = vld [vmem:[#allocation5 + $0xd8] sm:$0xff] }
 0x2f4   :  { %v875_v20 = vld [vmem:[#allocation5 + $0xe0] sm:$0xff] }
 0x2f5   :  { %v468_v22 = vmax.f32 %v3766_v19, 0.0  ;;  %v3871_v19 = vpack.c.bf16 %v874_v18, %v873_v17  ;;  %v1605_v17 = vld [vmem:[#allocation7 + $0x18] sm:$0xff] }
 0x2f7   :  { %2338 = vmatmul.mubr.f32.vlgmr.msra.gmra.mrb[10].mxu0 %v468_v22 }
 0x2f8   :  { %3028 = vmatpush3.bf16.msra.mxu0 %v3608_v9  ;;  %2407 = vmatprep.mubr.msk.f32.mxu0 %vm3484_vm0, %v3485_v1 }
 0x2f9   :  { %3029 = vmatprep.subr.bf16.mxu0 %v3483_v0 }
 0x2fc   :  { %3031 = vmatpush3.bf16.msra.mxu0 %v3611_v15 }
 0x2fd   :  { %3032 = vmatprep.subr.bf16.mxu0 %v3483_v0 }
 0x300   :  { %3034 = vmatpush3.bf16.msra.mxu0 %v3615_v21 }
 0x301   :  { %3035 = vmatprep.subr.bf16.mxu0 %v3483_v0 }
 0x304   :  { %3037 = vmatpush3.bf16.msra.mxu0 %v3622_v28 }
 0x305   :  { %3038 = vmatprep.subr.bf16.mxu0 %v3483_v0 }
 0x308   :  { %3040 = vmatpush3.bf16.msra.mxu0 %v3626_v34 }
 0x309   :  { %3041 = vmatprep.subr.bf16.mxu0 %v3483_v0 }
 0x30c   :  { %3043 = vmatpush3.bf16.msra.mxu0 %v3630_v40 }
 0x30d   :  { %3044 = vmatprep.subr.bf16.mxu0 %v3483_v0 }
 0x310   :  { %3046 = vmatpush3.bf16.msra.mxu0 %v3634_v46 }
 0x311   :  { %3047 = vmatprep.subr.bf16.mxu0 %v3483_v0 }
 0x314   :  { %3049 = vmatpush3.bf16.msra.mxu0 %v3638_v50 }
 0x315   :  { %3074 = vmatprep.subr.bf16.mxu0 %v3483_v0 }
 0x3ca   :  { %v538_v24 = vpop.f32.mrb[10].mxu0 }
 0x3cb   :  { %v3791_v25 = vadd.f32 %v538_v24, %v233_v23  ;;  %v2339_v26 = vpop.f32.mrb[11].mxu0  ;;  %v877_v24 = vld [vmem:[#allocation5 + $0xf0] sm:$0xff] }
 0x3cd   :  { %v543_v27 = vmax.f32 %v3791_v25, 0.0  ;;  %v878_v25 = vld [vmem:[#allocation5 + $0xf8] sm:$0xff] }
 0x3ce   :  { %v3879_v26 = vpack.c.bf16 %v878_v25, %v877_v24  ;;  %v1609_v24 = vld [vmem:[#allocation7 + $0x38] sm:$0xff] }
 0x3cf   :  { %2373 = vmatmul.mubr.f32.vlgmr.msra.gmra.mrb[4].mxu1 %v543_v27 }
 0x3d0   :  { %3052 = vmatpush3.bf16.msra.mxu1 %v3608_v9  ;;  %2442 = vmatprep.mubr.msk.f32.mxu1 %vm3484_vm0, %v3485_v1 }
 0x3d1   :  { %3053 = vmatprep.subr.bf16.mxu1 %v3483_v0 }
 0x3d4   :  { %3055 = vmatpush3.bf16.msra.mxu1 %v3611_v15 }
 0x3d5   :  { %3056 = vmatprep.subr.bf16.mxu1 %v3483_v0 }
 0x3d8   :  { %3058 = vmatpush3.bf16.msra.mxu1 %v3615_v21 }
 0x3d9   :  { %3059 = vmatprep.subr.bf16.mxu1 %v3483_v0 }
 0x3dc   :  { %3061 = vmatpush3.bf16.msra.mxu1 %v3622_v28 }
 0x3dd   :  { %3062 = vmatprep.subr.bf16.mxu1 %v3483_v0 }
 0x3e0   :  { %3064 = vmatpush3.bf16.msra.mxu1 %v3626_v34 }
 0x3e1   :  { %3065 = vmatprep.subr.bf16.mxu1 %v3483_v0 }
 0x3e4   :  { %3067 = vmatpush3.bf16.msra.mxu1 %v3630_v40 }
 0x3e5   :  { %3068 = vmatprep.subr.bf16.mxu1 %v3483_v0 }
 0x3e8   :  { %3070 = vmatpush3.bf16.msra.mxu1 %v3634_v46 }
 0x3e9   :  { %3071 = vmatprep.subr.bf16.mxu1 %v3483_v0 }
 0x3ec   :  { %3073 = vmatpush3.bf16.msra.mxu1 %v3638_v50 }
 0x4a2   :  { %v613_v30 = vpop.f32.mrb[4].mxu1 }
 0x4a3   :  { %v3815_v31 = vadd.f32 %v613_v30, %v234_v29  ;;  %v2374_v32 = vpop.f32.mrb[5].mxu1 }
 0x4a5   :  { %v618_v33 = vmax.f32 %v3815_v31, 0.0 }
 0x4a7   :  { %2408 = vmatmul.mubr.f32.vlgmr.msra.gmra.mrb[12].mxu0 %v618_v33 }
 0x4a8   :  { %3076 = vmatpush3.bf16.msra.mxu0 %v3608_v9  ;;  %2477 = vmatprep.mubr.msk.f32.mxu0 %vm3484_vm0, %v3485_v1  ;;  %v846_v9 = vld [vmem:[#allocation3 + $0x80] sm:$0xff] }
 0x4a9   :  { %3077 = vmatprep.subr.bf16.mxu0 %v3483_v0 }
 0x4ac   :  { %3079 = vmatpush3.bf16.msra.mxu0 %v3611_v15  ;;  %v847_v15 = vld [vmem:[#allocation3 + $0x88] sm:$0xff] }
 0x4ad   :  { %3080 = vmatprep.subr.bf16.mxu0 %v3483_v0 }
 0x4b0   :  { %3082 = vmatpush3.bf16.msra.mxu0 %v3615_v21  ;;  %v3098_v21 = vpack.c.bf16 %v847_v15, %v846_v9 }
 0x4b1   :  { %3083 = vmatprep.subr.bf16.mxu0 %v3483_v0 }
 0x4b2   :  { %3099 = vmatprep.subr.bf16.mxu1 %v3098_v21 }
 0x4b4   :  { %3085 = vmatpush3.bf16.msra.mxu0 %v3622_v28  ;;  %v235_v28 = vadd.f32 %v3715_v6, %v3705_v58 }
 0x4b5   :  { %3086 = vmatprep.subr.bf16.mxu0 %v3483_v0 }
 0x4b8   :  { %3088 = vmatpush3.bf16.msra.mxu0 %v3626_v34 }
 0x4b9   :  { %3089 = vmatprep.subr.bf16.mxu0 %v3483_v0 }
 0x4bc   :  { %3091 = vmatpush3.bf16.msra.mxu0 %v3630_v40  ;;  %v3102_v40 = vpack.c.bf16 %v849_v36, %v848_v35 }
 0x4bd   :  { %3092 = vmatprep.subr.bf16.mxu0 %v3483_v0 }
 0x4c0   :  { %3094 = vmatpush3.bf16.msra.mxu0 %v3634_v46  ;;  %v3110_v46 = vpack.c.bf16 %v853_v45, %v852_v44 }
 0x4c1   :  { %3095 = vmatprep.subr.bf16.mxu0 %v3483_v0 }
 0x4c4   :  { %3097 = vmatpush3.bf16.msra.mxu0 %v3638_v50  ;;  %v856_v50 = vld [vmem:[#allocation3 + $0xd0] sm:$0xff] }
 0x4c5   :  { %3130 = vmatprep.subr.bf16.mxu0 %v3483_v0  ;;  %v3118_v52 = vpack.c.bf16 %v857_v51, %v856_v50 }
 0x57a   :  { %v688_v34 = vpop.f32.mrb[12].mxu0 }
 0x57b   :  { %v692_v37 = vadd.f32 %v688_v34, %v235_v28  ;;  %v2409_v38 = vpop.f32.mrb[13].mxu0  ;;  %v237_v34 = vadd.f32 %v3737_v8, %v3705_v58 }
 0x57d   :  { %v693_v39 = vmax.f32 %v692_v37, 0.0 }
 0x57f   :  { %2443 = vmatmul.mubr.f32.vlgmr.msra.gmra.mrb[6].mxu1 %v693_v39 }
 0x580   :  { %3101 = vmatpush3.bf16.msra.mxu1 %v3098_v21  ;;  %2512 = vmatprep.mubr.f32.mxu1 %v318_v5  ;;  %v868_v5 = vld [vmem:[#allocation5 + $0xa8] sm:$0xff] }
 0x581   :  { %3103 = vmatprep.subr.bf16.mxu1 %v3102_v40  ;;  %v3859_v6 = vpack.c.bf16 %v868_v5, %v867_v4 }
 0x584   :  { %3105 = vmatpush3.bf16.msra.mxu1 %v3102_v40 }
 0x585   :  { %3107 = vmatprep.subr.bf16.mxu1 %v3106_v43 }
 0x588   :  { %3109 = vmatpush3.bf16.msra.mxu1 %v3106_v43 }
 0x589   :  { %3111 = vmatprep.subr.bf16.mxu1 %v3110_v46 }
 0x58c   :  { %3113 = vmatpush3.bf16.msra.mxu1 %v3110_v46 }
 0x58d   :  { %3115 = vmatprep.subr.bf16.mxu1 %v3114_v49 }
 0x590   :  { %3117 = vmatpush3.bf16.msra.mxu1 %v3114_v49 }
 0x591   :  { %3119 = vmatprep.subr.bf16.mxu1 %v3118_v52 }
 0x594   :  { %3121 = vmatpush3.bf16.msra.mxu1 %v3118_v52 }
 0x595   :  { %3123 = vmatprep.subr.bf16.mxu1 %v3122_v55 }
 0x598   :  { %3125 = vmatpush3.bf16.msra.mxu1 %v3122_v55 }
 0x599   :  { %3127 = vmatprep.subr.bf16.mxu1 %v3126_v59 }
 0x59c   :  { %3129 = vmatpush3.bf16.msra.mxu1 %v3126_v59 }
 0x59d   :  { %3154 = vmatprep.subr.bf16.mxu1 %v3483_v0 }
 0x59f   :  { %2513 = vmatmul.mubr.f32.vlgmr.msra.gmra.mrb[8].mxu1 %v393_v16  ;;  %v3867_v16 = vpack.c.bf16 %v872_v14, %v871_v13  ;;  %v1603_v13 = vld [vmem:[#allocation7 + $0x8] sm:$0xff]  ;;  %v1604_v14 = vld [vmem:[#allocation7 + $0x10] sm:$0xff] }
 0x5a0   :  { %2515 = vmatprep.mubr.f32.mxu1 %v468_v22  ;;  %3156 = vmatpush3.bf16.msra.mxu1 %v3851_v62  ;;  %v876_v22 = vld [vmem:[#allocation5 + $0xe8] sm:$0xff]  ;;  %v3326_v18 = vpack.c.bf16 %v1605_v17, %v1604_v14 }
 0x5a1   :  { %3157 = vmatprep.subr.bf16.mxu1 %v3483_v0  ;;  %v3875_v23 = vpack.c.bf16 %v876_v22, %v875_v20  ;;  %v1607_v20 = vld [vmem:[#allocation7 + $0x28] sm:$0xff] }
 0x5a3   :  { %2516 = vmatmul.mubr.f32.gmra.mrb[10].mxu1 %v543_v27  ;;  %v236_v27 = vadd.f32 %v3739_v10, %v3705_v58 }
 0x5a4   :  { %2518 = vmatprep.mubr.f32.mxu1 %v618_v33  ;;  %3159 = vmatpush3.bf16.msra.mxu1 %v3855_v3 }
 0x5a5   :  { %3160 = vmatprep.subr.bf16.mxu1 %v3483_v0 }
 0x5a7   :  { %2519 = vmatmul.mubr.f32.gmra.mrb[12].mxu1 %v693_v39  ;;  %v3937_v39 = vld [vmem:[%s4077_s3 + $0x8] sm:$0xff] }
 0x5a8   :  { %3162 = vmatpush3.bf16.msra.mxu1 %v3859_v6 }
 0x5a9   :  { %3163 = vmatprep.subr.bf16.mxu1 %v3483_v0 }
 0x5ac   :  { %3165 = vmatpush3.bf16.msra.mxu1 %v3863_v12 }
 0x5ad   :  { %3166 = vmatprep.subr.bf16.mxu1 %v3483_v0 }
 0x5b0   :  { %3168 = vmatpush3.bf16.msra.mxu1 %v3867_v16 }
 0x5b1   :  { %3169 = vmatprep.subr.bf16.mxu1 %v3483_v0 }
 0x5b4   :  { %3171 = vmatpush3.bf16.msra.mxu1 %v3871_v19 }
 0x5b5   :  { %3172 = vmatprep.subr.bf16.mxu1 %v3483_v0 }
 0x5b8   :  { %3174 = vmatpush3.bf16.msra.mxu1 %v3875_v23 }
 0x5b9   :  { %3175 = vmatprep.subr.bf16.mxu1 %v3483_v0 }
 0x5bc   :  { %3177 = vmatpush3.bf16.msra.mxu1 %v3879_v26 }
 0x5bd   :  { %3202 = vmatprep.subr.bf16.mxu1 %v3483_v0 }
 0x652   :  { %v763_v29 = vpop.f32.mrb[6].mxu1 }
 0x653   :  { %v767_v30 = vadd.f32 %v763_v29, %v236_v27  ;;  %v2444_v31 = vpop.f32.mrb[7].mxu1  ;;  %v1611_v27 = vld [vmem:[#allocation7 + $0x48] sm:$0xff] }
 0x654   :  { %v1613_v31 = vld [vmem:[#allocation7 + $0x58] sm:$0xff] }
 0x655   :  { %v768_v32 = vmax.f32 %v767_v30, 0.0  ;;  %v1612_v30 = vld [vmem:[#allocation7 + $0x50] sm:$0xff] }
 0x657   :  { %2478 = vmatmul.mubr.f32.vlgmr.msra.gmra.mrb[14].mxu0 %v768_v32  ;;  %2521 = vmatprep.mubr.f32.mxu1 %v768_v32  ;;  %v3338_v32 = vpack.c.bf16 %v1613_v31, %v1612_v30 }
 0x658   :  { %3132 = vmatpush3.bf16.msra.mxu0 %v3851_v62  ;;  %2556 = vmatprep.mubr.msk.f32.mxu0 %vm3484_vm0, %v3485_v1 }
 0x659   :  { %3133 = vmatprep.subr.bf16.mxu0 %v3483_v0 }
 0x65c   :  { %3135 = vmatpush3.bf16.msra.mxu0 %v3855_v3 }
 0x65d   :  { %3136 = vmatprep.subr.bf16.mxu0 %v3483_v0 }
 0x660   :  { %3138 = vmatpush3.bf16.msra.mxu0 %v3859_v6 }
 0x661   :  { %3139 = vmatprep.subr.bf16.mxu0 %v3483_v0 }
 0x664   :  { %3141 = vmatpush3.bf16.msra.mxu0 %v3863_v12 }
 0x665   :  { %3142 = vmatprep.subr.bf16.mxu0 %v3483_v0 }
 0x668   :  { %3144 = vmatpush3.bf16.msra.mxu0 %v3867_v16 }
 0x669   :  { %3145 = vmatprep.subr.bf16.mxu0 %v3483_v0 }
 0x66c   :  { %3147 = vmatpush3.bf16.msra.mxu0 %v3871_v19 }
 0x66d   :  { %3148 = vmatprep.subr.bf16.mxu0 %v3483_v0 }
 0x670   :  { %3150 = vmatpush3.bf16.msra.mxu0 %v3875_v23 }
 0x671   :  { %3151 = vmatprep.subr.bf16.mxu0 %v3483_v0 }
 0x672   :  { %v2514_v10 = vpop.f32.mrb[8].mxu1 }
 0x673   :  { %v955_v33 = vpop.f32.mrb[9].mxu1  ;;  %v995_v45 = vadd.f32 %v2514_v10, %v3937_v39  ;;  %v1614_v10 = vld [vmem:[#allocation7 + $0x60] sm:$0xff] }
 0x674   :  { %3153 = vmatpush3.bf16.msra.mxu0 %v3879_v26  ;;  %v994_v40 = vadd.f32 %v3937_v39, %v955_v33  ;;  %v1615_v33 = vld [vmem:[#allocation7 + $0x68] sm:$0xff] }
 0x675   :  { %3178 = vmatprep.subr.bf16.mxu0 %v3483_v0 }
 0x676   :  { %v3903_v9 = vpop.f32.mrb[10].mxu1 }
 0x677   :  { %v3905_v15 = vpop.f32.mrb[11].mxu1  ;;  %2557 = vmatmul.mubr.f32.vlgmr.msra.gmra.mrb[16].mxu0 %v3485_v1  ;;  %v997_v55 = vadd.f32 %v3903_v9, %v3937_v39  ;;  %v3341_v9 = vpack.c.bf16 %v1615_v33, %v1614_v10 }
 0x678   :  { %3180 = vmatpush3.bf16.msra.mxu0 %v3851_v62  ;;  %2626 = vmatprep.mubr.msk.f32.mxu0 %vm3484_vm0, %v3485_v1  ;;  %v996_v50 = vadd.f32 %v3937_v39, %v3905_v15 }
 0x679   :  { %3181 = vmatprep.subr.bf16.mxu0 %v3483_v0 }
 0x67a   :  { %v3912_v21 = vpop.f32.mrb[12].mxu1 }
 0x67b   :  { %v3914_v28 = vpop.f32.mrb[13].mxu1 }
 0x67c   :  { %3183 = vmatpush3.bf16.msra.mxu0 %v3855_v3  ;;  %v998_v61 = vadd.f32 %v3937_v39, %v3914_v28 }
 0x67d   :  { %3184 = vmatprep.subr.bf16.mxu0 %v3483_v0 }
 0x680   :  { %3186 = vmatpush3.bf16.msra.mxu0 %v3859_v6 }
 0x681   :  { %3187 = vmatprep.subr.bf16.mxu0 %v3483_v0 }
 0x684   :  { %3189 = vmatpush3.bf16.msra.mxu0 %v3863_v12 }
 0x685   :  { %3190 = vmatprep.subr.bf16.mxu0 %v3483_v0 }
 0x688   :  { %3192 = vmatpush3.bf16.msra.mxu0 %v3867_v16 }
 0x689   :  { %3193 = vmatprep.subr.bf16.mxu0 %v3483_v0 }
 0x68c   :  { %3195 = vmatpush3.bf16.msra.mxu0 %v3871_v19 }
 0x68d   :  { %3196 = vmatprep.subr.bf16.mxu0 %v3483_v0 }
 0x690   :  { %3198 = vmatpush3.bf16.msra.mxu0 %v3875_v23 }
 0x691   :  { %3199 = vmatprep.subr.bf16.mxu0 %v3483_v0 }
 0x694   :  { %3201 = vmatpush3.bf16.msra.mxu0 %v3879_v26 }
 0x695   :  { %3226 = vmatprep.subr.bf16.mxu0 %v3483_v0 }
 0x72a   :  { %v838_v35 = vpop.f32.mrb[14].mxu0 }
 0x72b   :  { %v842_v36 = vadd.f32 %v838_v35, %v237_v34  ;;  %v2479_v37 = vpop.f32.mrb[15].mxu0 }
 0x72c   :  { %v1617_v37 = vld [vmem:[#allocation7 + $0x78] sm:$0xff] }
 0x72d   :  { %v843_v38 = vmax.f32 %v842_v36, 0.0  ;;  %v1616_v36 = vld [vmem:[#allocation7 + $0x70] sm:$0xff] }
 0x72f   :  { %2522 = vmatmul.mubr.f32.gmra.mrb[14].mxu1 %v843_v38  ;;  %v3344_v38 = vpack.c.bf16 %v1617_v37, %v1616_v36 }
 0x730   :  { %2591 = vmatprep.mubr.msk.f32.mxu1 %vm3484_vm0, %v3485_v1 }
 0x74a   :  { %v1077_v41 = vpop.f32.mrb[16].mxu0 }
 0x74b   :  { %v1081_v42 = vadd.f32 %v1077_v41, %v994_v40  ;;  %v2558_v43 = vpop.f32.mrb[17].mxu0  ;;  %v1690_v40 = vld [vmem:[#allocation8] sm:$0xff]  ;;  %v1691_v41 = vld [vmem:[#allocation8 + $0x8] sm:$0xff] }
 0x74c   :  { %v3347_v43 = vpack.c.bf16 %v1691_v41, %v1690_v40 }
 0x74d   :  { %v1082_v44 = vmax.f32 %v1081_v42, 0.0  ;;  %v1692_v42 = vld [vmem:[#allocation8 + $0x10] sm:$0xff] }
 0x74f   :  { %2592 = vmatmul.mubr.f32.vlgmr.msra.gmra.mrb[16].mxu1 %v1082_v44  ;;  %v1693_v44 = vld [vmem:[#allocation8 + $0x18] sm:$0xff] }
 0x750   :  { %3204 = vmatpush3.bf16.msra.mxu1 %v3851_v62  ;;  %2661 = vmatprep.mubr.msk.f32.mxu1 %vm3484_vm0, %v3485_v1 }
 0x751   :  { %3205 = vmatprep.subr.bf16.mxu1 %v3483_v0 }
 0x754   :  { %3207 = vmatpush3.bf16.msra.mxu1 %v3855_v3 }
 0x755   :  { %3208 = vmatprep.subr.bf16.mxu1 %v3483_v0 }
 0x758   :  { %3210 = vmatpush3.bf16.msra.mxu1 %v3859_v6 }
 0x759   :  { %3211 = vmatprep.subr.bf16.mxu1 %v3483_v0 }
 0x75c   :  { %3213 = vmatpush3.bf16.msra.mxu1 %v3863_v12 }
 0x75d   :  { %3214 = vmatprep.subr.bf16.mxu1 %v3483_v0 }
 0x760   :  { %3216 = vmatpush3.bf16.msra.mxu1 %v3867_v16 }
 0x761   :  { %3217 = vmatprep.subr.bf16.mxu1 %v3483_v0 }
 0x764   :  { %3219 = vmatpush3.bf16.msra.mxu1 %v3871_v19 }
 0x765   :  { %3220 = vmatprep.subr.bf16.mxu1 %v3483_v0 }
 0x768   :  { %3222 = vmatpush3.bf16.msra.mxu1 %v3875_v23 }
 0x769   :  { %3223 = vmatprep.subr.bf16.mxu1 %v3483_v0 }
 0x76c   :  { %3225 = vmatpush3.bf16.msra.mxu1 %v3879_v26 }
 0x76d   :  { %3250 = vmatprep.subr.bf16.mxu1 %v3483_v0 }
 0x802   :  { %v3958_v58 = vpop.f32.mrb[14].mxu1 }
 0x803   :  { %v3960_v8 = vpop.f32.mrb[15].mxu1 }
 0x804   :  { %v1000_v15 = vadd.f32 %v3937_v39, %v3960_v8  ;;  %v1694_v8 = vld [vmem:[#allocation8 + $0x20] sm:$0xff] }
 0x822   :  { %v1151_v46 = vpop.f32.mrb[16].mxu1 }
 0x823   :  { %v1155_v47 = vadd.f32 %v1151_v46, %v995_v45  ;;  %v2593_v48 = vpop.f32.mrb[17].mxu1  ;;  %v3350_v45 = vpack.c.bf16 %v1693_v44, %v1692_v42  ;;  %v1695_v46 = vld [vmem:[#allocation8 + $0x28] sm:$0xff] }
 0x824   :  { %v1697_v48 = vld [vmem:[#allocation8 + $0x38] sm:$0xff] }
 0x825   :  { %v1156_v49 = vmax.f32 %v1155_v47, 0.0  ;;  %v3353_v47 = vpack.c.bf16 %v1695_v46, %v1694_v8 }
 0x827   :  { %2627 = vmatmul.mubr.f32.vlgmr.msra.gmra.mrb[18].mxu0 %v1156_v49 }
 0x828   :  { %3228 = vmatpush3.bf16.msra.mxu0 %v3851_v62  ;;  %2696 = vmatprep.mubr.msk.f32.mxu0 %vm3484_vm0, %v3485_v1 }
 0x829   :  { %3229 = vmatprep.subr.bf16.mxu0 %v3483_v0 }
 0x82c   :  { %3231 = vmatpush3.bf16.msra.mxu0 %v3855_v3 }
 0x82d   :  { %3232 = vmatprep.subr.bf16.mxu0 %v3483_v0 }
 0x830   :  { %3234 = vmatpush3.bf16.msra.mxu0 %v3859_v6 }
 0x831   :  { %3235 = vmatprep.subr.bf16.mxu0 %v3483_v0 }
 0x834   :  { %3237 = vmatpush3.bf16.msra.mxu0 %v3863_v12 }
 0x835   :  { %3238 = vmatprep.subr.bf16.mxu0 %v3483_v0 }
 0x838   :  { %3240 = vmatpush3.bf16.msra.mxu0 %v3867_v16 }
 0x839   :  { %3241 = vmatprep.subr.bf16.mxu0 %v3483_v0 }
 0x83c   :  { %3243 = vmatpush3.bf16.msra.mxu0 %v3871_v19 }
 0x83d   :  { %3244 = vmatprep.subr.bf16.mxu0 %v3483_v0 }
 0x840   :  { %3246 = vmatpush3.bf16.msra.mxu0 %v3875_v23 }
 0x841   :  { %3247 = vmatprep.subr.bf16.mxu0 %v3483_v0 }
 0x844   :  { %3249 = vmatpush3.bf16.msra.mxu0 %v3879_v26 }
 0x845   :  { %3274 = vmatprep.subr.bf16.mxu0 %v3483_v0 }
 0x8fa   :  { %v1225_v51 = vpop.f32.mrb[18].mxu0 }
 0x8fb   :  { %v1229_v52 = vadd.f32 %v1225_v51, %v996_v50  ;;  %v2628_v53 = vpop.f32.mrb[19].mxu0  ;;  %v1698_v50 = vld [vmem:[#allocation8 + $0x40] sm:$0xff]  ;;  %v1699_v51 = vld [vmem:[#allocation8 + $0x48] sm:$0xff] }
 0x8fc   :  { %v1700_v53 = vld [vmem:[#allocation8 + $0x50] sm:$0xff] }
 0x8fd   :  { %v1230_v54 = vmax.f32 %v1229_v52, 0.0  ;;  %v3359_v52 = vpack.c.bf16 %v1699_v51, %v1698_v50 }
 0x8ff   :  { %2662 = vmatmul.mubr.f32.vlgmr.msra.gmra.mrb[18].mxu1 %v1230_v54  ;;  %v1701_v54 = vld [vmem:[#allocation8 + $0x58] sm:$0xff] }
 0x900   :  { %3252 = vmatpush3.bf16.msra.mxu1 %v3851_v62  ;;  %2731 = vmatprep.mubr.msk.f32.mxu1 %vm3484_vm0, %v3485_v1 }
 0x901   :  { %3253 = vmatprep.subr.bf16.mxu1 %v3483_v0 }
 0x904   :  { %3255 = vmatpush3.bf16.msra.mxu1 %v3855_v3 }
 0x905   :  { %3256 = vmatprep.subr.bf16.mxu1 %v3483_v0 }
 0x908   :  { %3258 = vmatpush3.bf16.msra.mxu1 %v3859_v6 }
 0x909   :  { %3259 = vmatprep.subr.bf16.mxu1 %v3483_v0 }
 0x90c   :  { %3261 = vmatpush3.bf16.msra.mxu1 %v3863_v12 }
 0x90d   :  { %3262 = vmatprep.subr.bf16.mxu1 %v3483_v0 }
 0x910   :  { %3264 = vmatpush3.bf16.msra.mxu1 %v3867_v16 }
 0x911   :  { %3265 = vmatprep.subr.bf16.mxu1 %v3483_v0 }
 0x914   :  { %3267 = vmatpush3.bf16.msra.mxu1 %v3871_v19 }
 0x915   :  { %3268 = vmatprep.subr.bf16.mxu1 %v3483_v0 }
 0x918   :  { %3270 = vmatpush3.bf16.msra.mxu1 %v3875_v23 }
 0x919   :  { %3271 = vmatprep.subr.bf16.mxu1 %v3483_v0 }
 0x91c   :  { %3273 = vmatpush3.bf16.msra.mxu1 %v3879_v26 }
 0x91d   :  { %3298 = vmatprep.subr.bf16.mxu1 %v3483_v0 }
 0x9d2   :  { %v1299_v56 = vpop.f32.mrb[18].mxu1 }
 0x9d3   :  { %v1303_v57 = vadd.f32 %v1299_v56, %v997_v55  ;;  %v2663_v59 = vpop.f32.mrb[19].mxu1  ;;  %v3362_v55 = vpack.c.bf16 %v1701_v54, %v1700_v53  ;;  %v1702_v56 = vld [vmem:[#allocation8 + $0x60] sm:$0xff] }
 0x9d5   :  { %v1304_v60 = vmax.f32 %v1303_v57, 0.0  ;;  %v1703_v57 = vld [vmem:[#allocation8 + $0x68] sm:$0xff] }
 0x9d6   :  { %v3365_v59 = vpack.c.bf16 %v1703_v57, %v1702_v56 }
 0x9d7   :  { %2697 = vmatmul.mubr.f32.vlgmr.msra.gmra.mrb[20].mxu0 %v1304_v60  ;;  %v1001_v60 = vadd.f32 %v3958_v58, %v3937_v39 }
 0x9d8   :  { %3276 = vmatpush3.bf16.msra.mxu0 %v3851_v62  ;;  %2766 = vmatprep.mubr.msk.f32.mxu0 %vm3484_vm0, %v3485_v1 }
 0x9d9   :  { %3277 = vmatprep.subr.bf16.mxu0 %v3483_v0 }
 0x9dc   :  { %3279 = vmatpush3.bf16.msra.mxu0 %v3855_v3 }
 0x9dd   :  { %3280 = vmatprep.subr.bf16.mxu0 %v3483_v0 }
 0x9e0   :  { %3282 = vmatpush3.bf16.msra.mxu0 %v3859_v6 }
 0x9e1   :  { %3283 = vmatprep.subr.bf16.mxu0 %v3483_v0 }
 0x9e4   :  { %3285 = vmatpush3.bf16.msra.mxu0 %v3863_v12 }
 0x9e5   :  { %3286 = vmatprep.subr.bf16.mxu0 %v3483_v0 }
 0x9e8   :  { %3288 = vmatpush3.bf16.msra.mxu0 %v3867_v16 }
 0x9e9   :  { %3289 = vmatprep.subr.bf16.mxu0 %v3483_v0 }
 0x9ec   :  { %3291 = vmatpush3.bf16.msra.mxu0 %v3871_v19 }
 0x9ed   :  { %3292 = vmatprep.subr.bf16.mxu0 %v3483_v0 }
 0x9f0   :  { %3294 = vmatpush3.bf16.msra.mxu0 %v3875_v23 }
 0x9f1   :  { %3295 = vmatprep.subr.bf16.mxu0 %v3483_v0 }
 0x9f4   :  { %3297 = vmatpush3.bf16.msra.mxu0 %v3879_v26 }
 0x9f5   :  { %3322 = vmatprep.subr.bf16.mxu0 %v3483_v0 }
 0xaaa   :  { %v1373_v63 = vpop.f32.mrb[20].mxu0 }
 0xaab   :  { %v1377_v2 = vadd.f32 %v1373_v63, %v998_v61  ;;  %v2698_v4 = vpop.f32.mrb[21].mxu0 }
 0xaad   :  { %v1378_v5 = vmax.f32 %v1377_v2, 0.0 }
 0xaaf   :  { %2732 = vmatmul.mubr.f32.vlgmr.msra.gmra.mrb[20].mxu1 %v1378_v5  ;;  %v1704_v5 = vld [vmem:[#allocation8 + $0x70] sm:$0xff] }
 0xab0   :  { %3300 = vmatpush3.bf16.msra.mxu1 %v3851_v62  ;;  %2801 = vmatprep.mubr.msk.f32.mxu1 %vm3484_vm0, %v3485_v1  ;;  %v999_v62 = vadd.f32 %v3912_v21, %v3937_v39  ;;  %v1706_v39 = vld [vmem:[%s4081_s7] sm:$0xff] }
 0xab1   :  { %3301 = vmatprep.subr.bf16.mxu1 %v3483_v0 }
 0xab4   :  { %3303 = vmatpush3.bf16.msra.mxu1 %v3855_v3 }
 0xab5   :  { %3304 = vmatprep.subr.bf16.mxu1 %v3483_v0 }
 0xab8   :  { %3306 = vmatpush3.bf16.msra.mxu1 %v3859_v6 }
 0xab9   :  { %3307 = vmatprep.subr.bf16.mxu1 %v3483_v0 }
 0xabc   :  { %3309 = vmatpush3.bf16.msra.mxu1 %v3863_v12  ;;  %v1602_v12 = vld [vmem:[#allocation7] sm:$0xff] }
 0xabd   :  { %3310 = vmatprep.subr.bf16.mxu1 %v3483_v0 }
 0xac0   :  { %3312 = vmatpush3.bf16.msra.mxu1 %v3867_v16  ;;  %v3323_v16 = vpack.c.bf16 %v1603_v13, %v1602_v12  ;;  %v1778_v13 = vlaneseq }
 0xac1   :  { %3313 = vmatprep.subr.bf16.mxu1 %v3483_v0 }
 0xac2   :  { %v1779_v58 = vand.u32 127, %v1778_v13 }
 0xac4   :  { %3315 = vmatpush3.bf16.msra.mxu1 %v3871_v19  ;;  %v1606_v19 = vld [vmem:[#allocation7 + $0x20] sm:$0xff]  ;;  %vm1780_vm1 = vcmp.lt.s32.totalorder %v1779_v58, 5 }
 0xac5   :  { %3316 = vmatprep.subr.bf16.mxu1 %v3483_v0  ;;  %v3329_v22 = vpack.c.bf16 %v1607_v20, %v1606_v19 }
 0xac8   :  { %3318 = vmatpush3.bf16.msra.mxu1 %v3875_v23  ;;  %v1608_v23 = vld [vmem:[#allocation7 + $0x30] sm:$0xff] }
 0xac9   :  { %3319 = vmatprep.subr.bf16.mxu1 %v3483_v0  ;;  %v3332_v25 = vpack.c.bf16 %v1609_v24, %v1608_v23 }
 0xacc   :  { %3321 = vmatpush3.bf16.msra.mxu1 %v3879_v26  ;;  %v1610_v26 = vld [vmem:[#allocation7 + $0x40] sm:$0xff] }
 0xacd   :  { %3346 = vmatprep.subr.bf16.mxu1 %v3483_v0  ;;  %v3335_v29 = vpack.c.bf16 %v1611_v27, %v1610_v26 }
 0xb82   :  { %v1447_v3 = vpop.f32.mrb[20].mxu1 }
 0xb83   :  { %v1451_v6 = vadd.f32 %v1447_v3, %v999_v62  ;;  %v2733_v7 = vpop.f32.mrb[21].mxu1  ;;  %v1705_v62 = vld [vmem:[#allocation8 + $0x78] sm:$0xff] }
 0xb84   :  { %v3368_v3 = vpack.c.bf16 %v1705_v62, %v1704_v5 }
 0xb85   :  { %v1452_v11 = vmax.f32 %v1451_v6, 0.0  ;;  %v1618_v6 = vld [vmem:[%s4079_s5] sm:$0xff] }
 0xb87   :  { %2767 = vmatmul.mubr.f32.vlgmr.msra.gmra.mrb[22].mxu0 %v1452_v11 }
 0xb88   :  { %2836 = vmatprep.mubr.msk.f32.mxu0 %vm3484_vm0, %v3485_v1  ;;  %3324 = vmatpush3.bf16.msra.mxu0 %v3323_v16 }
 0xb89   :  { %3325 = vmatprep.subr.bf16.mxu0 %v3483_v0 }
 0xb8c   :  { %3327 = vmatpush3.bf16.msra.mxu0 %v3326_v18 }
 0xb8d   :  { %3328 = vmatprep.subr.bf16.mxu0 %v3483_v0 }
 0xb90   :  { %3330 = vmatpush3.bf16.msra.mxu0 %v3329_v22 }
 0xb91   :  { %3331 = vmatprep.subr.bf16.mxu0 %v3483_v0 }
 0xb94   :  { %3333 = vmatpush3.bf16.msra.mxu0 %v3332_v25 }
 0xb95   :  { %3334 = vmatprep.subr.bf16.mxu0 %v3483_v0 }
 0xb98   :  { %3336 = vmatpush3.bf16.msra.mxu0 %v3335_v29 }
 0xb99   :  { %3337 = vmatprep.subr.bf16.mxu0 %v3483_v0 }
 0xb9c   :  { %3339 = vmatpush3.bf16.msra.mxu0 %v3338_v32 }
 0xb9d   :  { %3340 = vmatprep.subr.bf16.mxu0 %v3483_v0 }
 0xba0   :  { %3342 = vmatpush3.bf16.msra.mxu0 %v3341_v9 }
 0xba1   :  { %3343 = vmatprep.subr.bf16.mxu0 %v3483_v0 }
 0xba4   :  { %3345 = vmatpush3.bf16.msra.mxu0 %v3344_v38 }
 0xc5a   :  { %v1521_v21 = vpop.f32.mrb[22].mxu0 }
 0xc5b   :  { %v1525_v28 = vadd.f32 %v1521_v21, %v1000_v15  ;;  %v2768_v34 = vpop.f32.mrb[23].mxu0 }
 0xc5d   :  { %v1526_v35 = vmax.f32 %v1525_v28, 0.0 }
 0xc5f   :  { %2802 = vmatmul.mubr.f32.vlgmr.msra.gmra.mrb[22].mxu1 %v1526_v35 }
 0xc60   :  { %2871 = vmatprep.mubr.msk.f32.mxu1 %vm3484_vm0, %v3485_v1  ;;  %3348 = vmatpush3.bf16.msra.mxu1 %v3347_v43  ;;  %v1696_v1 = vld [vmem:[#allocation8 + $0x30] sm:$0xff] }
 0xc61   :  { %3349 = vmatprep.subr.bf16.mxu1 %v3483_v0  ;;  %v3356_v49 = vpack.c.bf16 %v1697_v48, %v1696_v1 }
 0xc64   :  { %3351 = vmatpush3.bf16.msra.mxu1 %v3350_v45 }
 0xc65   :  { %3352 = vmatprep.subr.bf16.mxu1 %v3483_v0 }
 0xc68   :  { %3354 = vmatpush3.bf16.msra.mxu1 %v3353_v47 }
 0xc69   :  { %3355 = vmatprep.subr.bf16.mxu1 %v3483_v0 }
 0xc6c   :  { %3357 = vmatpush3.bf16.msra.mxu1 %v3356_v49 }
 0xc6d   :  { %3358 = vmatprep.subr.bf16.mxu1 %v3483_v0 }
 0xc70   :  { %3360 = vmatpush3.bf16.msra.mxu1 %v3359_v52 }
 0xc71   :  { %3361 = vmatprep.subr.bf16.mxu1 %v3483_v0 }
 0xc74   :  { %3363 = vmatpush3.bf16.msra.mxu1 %v3362_v55 }
 0xc75   :  { %3364 = vmatprep.subr.bf16.mxu1 %v3483_v0 }
 0xc78   :  { %3366 = vmatpush3.bf16.msra.mxu1 %v3365_v59 }
 0xc79   :  { %3367 = vmatprep.subr.bf16.mxu1 %v3483_v0 }
 0xc7c   :  { %3369 = vmatpush3.bf16.msra.mxu1 %v3368_v3 }
 0xd32   :  { %v1595_v61 = vpop.f32.mrb[22].mxu1 }
 0xd33   :  { %v1599_v63 = vadd.f32 %v1595_v61, %v1001_v60  ;;  %v2803_v2 = vpop.f32.mrb[23].mxu1 }
 0xd35   :  { %v1600_v4 = vmax.f32 %v1599_v63, 0.0 }
 0xd37   :  { %2837 = vmatmul.mubr.f32.vlgmr.msra.gmra.mrb[24].mxu0 %v1600_v4 }
 0xe0a   :  { %v1685_v7 = vpop.f32.mrb[24].mxu0 }
 0xe0b   :  { %v1686_v11 = vadd.f32 %v1685_v7, %v1618_v6  ;;  %v2838_v12 = vpop.f32.mrb[25].mxu0 }
 0xe0d   :  { %v1689_v0 = vmax.f32 %v1686_v11, 0.0 }
 0xe0f   :  { %2872 = vmatmul.mubr.f32.vlgmr.msra.gmra.mrb[24].mxu1 %v1689_v0 }
 0xee2   :  { %v1773_v14 = vpop.f32.mrb[24].mxu1 }
 0xee3   :  { %v1774_v16 = vadd.f32 %v1773_v14, %v1706_v39  ;;  %v2873_v17 = vpop.f32.mrb[25].mxu1 }
 0xee5   :  { %v1777_v18 = vmax.f32 %v1774_v16, 0.0 }
 0xee7   :  { %v1781_v19 = vsel %vm1780_vm1, %v1777_v18, -1e+30 }
 0xee8   :  { %1782 = vmax.xlane.f32.xlu0 %v1781_v19 }
 0xf75   :  { %v1783_v20 = vpop.xlane.xlu0 %1782 }
 0xf76   :  { %v1784_v22 = vsub.f32 %v1781_v19, %v1783_v20 }
 0xf78   :  { %v1785_v23 = vmul.f32 1.442695, %v1784_v22 }
 0xf7a   :  { %3379 = vpow2.f32 %v1785_v23 }
 0xf84   :  { %v3380_v24 = vpop.eup %3379 }
 0xf85   :  { %1787 = vadd.xlane.f32.xlu0 %v3380_v24 }
0x1012   :  { %v1788_v25 = vpop.xlane.xlu0 %1787 }
0x1013   :  { %3381 = vlog2.f32 %v1788_v25 }
0x101d   :  { %v3382_v26 = vpop.eup %3381 }
0x101e   :  { %v1790_v27 = vmul.f32 0.6931472, %v3382_v26 }
0x1020   :  { %v1791_v29 = vadd.f32 %v1790_v27, %v1783_v20 }
0x1022   :  { %v1792_v30 = vsub.f32 %v1777_v18, %v1791_v29 }
0x1024   :  { %1793 = vst [vmem:[%s4082_s8] sm:$0xff] %v1792_v30 }
0x1025   :  { %1798 = vsyncpa [#allocation4], 1 }
0x1026   :  { %1799 = vsyncpa [#allocation6], 1 }
0x1027   :  { %1800 = vsyncpa [#allocation9], 1 }

</bundles_post_ra>
